<compile_context>
chip_gen: v7x
topology: tpu7x:2x2x1
jax: 0.10.0
libtpu: 0.0.40
codegen_flags: <defaults>
</compile_context>

<pallas_src>
import functools

import jax
import jax.numpy as jnp
from jax import lax
from jax.experimental import pallas as pl
from jax.experimental.pallas import tpu as pltpu

BN_EPS = 1e-5                     # PyTorch BatchNorm2d default
LANE = 128                        # lane width / MXU-aligned channel padding
_VMEM_LIMIT = 32 * 1024 * 1024    # >= v5e default (16 MiB), == v6e/v7x default,
                                  # well under v7x's 64 MiB physical VMEM.


def _round_up(x, m):
    return (x + m - 1) // m * m


# ---------------------------------------------------------------------------
# in-kernel helpers
# ---------------------------------------------------------------------------
def _write_halo(pad_ref, interior, H, W):
    """Zero only the 4 thin halo rings, then write the interior once."""
    C = pad_ref.shape[-1]
    Wp = pad_ref.shape[1]
    dt = pad_ref.dtype
    pad_ref[0:1, :, :] = jnp.zeros((1, Wp, C), dt)
    pad_ref[H + 1:H + 2, :, :] = jnp.zeros((1, Wp, C), dt)
    pad_ref[:, 0:1, :] = jnp.zeros((H + 2, 1, C), dt)
    pad_ref[:, W + 1:W + 2, :] = jnp.zeros((H + 2, 1, C), dt)
    pad_ref[1:H + 1, 1:W + 1, :] = interior.astype(dt)


def _conv3x3_accum(pad_ref, w_ref, acc_ref, H, W):
    """3x3 conv as 9 accumulated MXU matmuls (K = C per tap), f32 accumulator.

    No im2col slab is materialized; operands stay bf16.
    """
    C = pad_ref.shape[-1]
    acc_ref[...] = jnp.zeros_like(acc_ref)
    for t in range(9):                                   # static unroll: 9 taps
        dy, dx = divmod(t, 3)
        tap = pad_ref[dy:dy + H, dx:dx + W, :].reshape(H * W, C)
        acc_ref[...] += jnp.dot(tap, w_ref[t],
                                preferred_element_type=jnp.float32)


def _emit_y_and_stats(acc_ref, y_ref, stats_ref):
    y = acc_ref[...]                                     # (M, Cop) f32
    y_ref[0] = y
    stats_ref[0, 0:1, :] = jnp.sum(y, axis=0, keepdims=True)       # per-chan sum
    stats_ref[0, 1:2, :] = jnp.sum(y * y, axis=0, keepdims=True)   # per-chan sumsq


# ---------------------------------------------------------------------------
# kernels
# ---------------------------------------------------------------------------
def _conv_stats_kernel(x_ref, w_ref, y_ref, stats_ref, pad_ref, acc_ref, *, H, W):
    # x_ref:(1,H,W,Cin) bf16   w_ref:(9,Cin,Cop) bf16
    # y_ref:(1,H*W,Cop) f32    stats_ref:(1,2,Cop) f32
    # pad_ref:(H+2,Wp,Cin) bf16 scratch   acc_ref:(H*W,Cop) f32 scratch
    _write_halo(pad_ref, x_ref[0], H, W)
    _conv3x3_accum(pad_ref, w_ref, acc_ref, H, W)
    _emit_y_and_stats(acc_ref, y_ref, stats_ref)


def _bnrelu_conv_stats_kernel(scale_ref, shift_ref, y_in_ref, w_ref,
                              y_ref, stats_ref, pad_ref, acc_ref, *, H, W):
    # Fused: BN(prev block) + ReLU on y_in, cast bf16, then conv + stats.
    a = jnp.maximum(y_in_ref[0] * scale_ref[...] + shift_ref[...], 0.0)
    a = a.astype(pad_ref.dtype).reshape(H, W, -1)        # free retile (W % 16 == 0)
    _write_halo(pad_ref, a, H, W)
    _conv3x3_accum(pad_ref, w_ref, acc_ref, H, W)
    _emit_y_and_stats(acc_ref, y_ref, stats_ref)


def _bnrelu_kernel(scale_ref, shift_ref, y_ref, out_ref):
    out_ref[...] = jnp.maximum(
        y_ref[...] * scale_ref[...] + shift_ref[...], 0.0).astype(out_ref.dtype)


# ---------------------------------------------------------------------------
# wrapper
# ---------------------------------------------------------------------------
def _pack_w(w_oihw, cin_pad, cout_pad):
    # OIHW -> (ky,kx,cin,cout) -> (9,cin,cout), zero-padded to lane/MXU-aligned
    # channel counts.  Tap order t = 3*ky + kx matches _conv3x3_accum.
    o, i = w_oihw.shape[0], w_oihw.shape[1]
    w = jnp.transpose(w_oihw, (2, 3, 1, 0)).reshape(9, i, o)
    w = jnp.pad(w, ((0, 0), (0, cin_pad - i), (0, cout_pad - o)))
    return w.astype(jnp.bfloat16)


def _pad_chan(v, n):
    return jnp.pad(v.astype(jnp.float32), (0, n - v.shape[0]))


def _finalize_bn(stats, g, be, count):
    """Reduce per-batch partial (sum, sumsq) and fold train-mode BN into one FMA."""
    s = jnp.sum(stats[:, 0, :], axis=0)
    ss = jnp.sum(stats[:, 1, :], axis=0)
    mean = s / count
    var = jnp.maximum(ss / count - mean * mean, 0.0)     # clamp one-pass variance
    scale = g * lax.rsqrt(var + BN_EPS)
    shift = be - mean * scale
    return scale.reshape(1, -1), shift.reshape(1, -1)


def double_conv_forward(x_nchw, params):
    """x_nchw: (B, Cin, H, W) f32.  Returns (B, Cout, H, W) f32 (PyTorch layout)."""
    B, Cin, H, W = x_nchw.shape
    Cout = params["w1"].shape[0]
    Cop = _round_up(max(Cout, LANE), LANE)   # lane-dense / MXU-aligned channels
    M = H * W
    Wp = _round_up(W + 2, 16)                # bf16 sublane-aligned scratch width
    n_px = B * M                             # BN population size (N*H*W)

    # Layout glue only (XLA side): NCHW -> NHWC, bf16 MXU operand.
    x = jnp.transpose(x_nchw, (0, 2, 3, 1)).astype(jnp.bfloat16)

    w1 = _pack_w(params["w1"], Cin, Cop)     # (9, Cin, Cop) bf16
    w2 = _pack_w(params["w2"], Cop, Cop)     # (9, Cop, Cop) bf16
    g1, be1 = _pad_chan(params["g1"], Cop), _pad_chan(params["be1"], Cop)
    g2, be2 = _pad_chan(params["g2"], Cop), _pad_chan(params["be2"], Cop)
    # NOTE: conv biases b1/b2 intentionally unused — train-mode BN subtracts the
    # batch mean, which cancels them exactly (invalid for eval-mode BN).

    cparams = pltpu.CompilerParams(dimension_semantics=("parallel",),
                                   vmem_limit_bytes=_VMEM_LIMIT)

    y_struct = jax.ShapeDtypeStruct((B, M, Cop), jnp.float32)
    st_struct = jax.ShapeDtypeStruct((B, 2, Cop), jnp.float32)
    y_spec = pl.BlockSpec((1, M, Cop), lambda b: (b, 0, 0))
    st_spec = pl.BlockSpec((1, 2, Cop), lambda b: (b, 0, 0))
    vec_spec = pl.BlockSpec((1, Cop), lambda b: (0, 0))

    # ---- block 1: conv1 + partial BN stats ---------------------------------
    y1, stats1 = pl.pallas_call(
        functools.partial(_conv_stats_kernel, H=H, W=W),
        grid=(B,),
        in_specs=[pl.BlockSpec((1, H, W, Cin), lambda b: (b, 0, 0, 0)),
                  pl.BlockSpec((9, Cin, Cop), lambda b: (0, 0, 0))],
        out_specs=(y_spec, st_spec),
        out_shape=(y_struct, st_struct),
        scratch_shapes=[pltpu.VMEM((H + 2, Wp, Cin), jnp.bfloat16),
                        pltpu.VMEM((M, Cop), jnp.float32)],
        compiler_params=cparams,
        cost_estimate=pl.CostEstimate(
            flops=2 * B * M * 9 * Cin * Cop + 4 * B * M * Cop,
            transcendentals=0,
            bytes_accessed=x.size * 2 + w1.size * 2 + (B * M * Cop + B * 2 * Cop) * 4),
    )(x, w1)
    scale1, shift1 = _finalize_bn(stats1, g1, be1, n_px)

    # ---- block 2: BN1+ReLU fused with conv2 + partial BN stats -------------
    y2, stats2 = pl.pallas_call(
        functools.partial(_bnrelu_conv_stats_kernel, H=H, W=W),
        grid=(B,),
        in_specs=[vec_spec, vec_spec, y_spec,
                  pl.BlockSpec((9, Cop, Cop), lambda b: (0, 0, 0))],
        out_specs=(y_spec, st_spec),
        out_shape=(y_struct, st_struct),
        scratch_shapes=[pltpu.VMEM((H + 2, Wp, Cop), jnp.bfloat16),
                        pltpu.VMEM((M, Cop), jnp.float32)],
        compiler_params=cparams,
        cost_estimate=pl.CostEstimate(
            flops=2 * B * M * 9 * Cop * Cop + 7 * B * M * Cop,
            transcendentals=0,
            bytes_accessed=w2.size * 2 + (2 * B * M * Cop + B * 2 * Cop) * 4),
    )(scale1, shift1, y1, w2)
    scale2, shift2 = _finalize_bn(stats2, g2, be2, n_px)

    # ---- block 2 epilogue: BN2 + ReLU ---------------------------------------
    out_flat = pl.pallas_call(
        _bnrelu_kernel,
        grid=(B,),
        in_specs=[vec_spec, vec_spec, y_spec],
        out_specs=y_spec,
        out_shape=y_struct,
        compiler_params=cparams,
    )(scale2, shift2, y2)

    # Slice off channel padding, back to NCHW (layout glue in XLA).
    out = out_flat[:, :, :Cout].reshape(B, H, W, Cout)
    return jnp.transpose(out, (0, 3, 1, 2))


# ---------------------------------------------------------------------------
# references & test
# ---------------------------------------------------------------------------
def _reference_forward(x_nchw, params, *, mxu_bf16=False):
    """Pure-JAX reference mirroring PyTorch (training-mode BN, conv bias kept).

    mxu_bf16=True casts conv inputs to bf16 (like the kernel's MXU operands),
    giving a much tighter comparison that would catch tap/weight-order bugs.
    """
    def cast(a):
        return a.astype(jnp.bfloat16).astype(jnp.float32) if mxu_bf16 else a

    def conv(x, w, b):
        y = lax.conv_general_dilated(
            cast(x), cast(w), window_strides=(1, 1), padding=((1, 1), (1, 1)),
            dimension_numbers=("NCHW", "OIHW", "NCHW"),
            precision=lax.Precision.HIGHEST)
        return y + b[None, :, None, None]

    def bn_relu(y, g, be):
        mean = jnp.mean(y, axis=(0, 2, 3), keepdims=True)
        var = jnp.mean((y - mean) ** 2, axis=(0, 2, 3), keepdims=True)
        yhat = (y - mean) * lax.rsqrt(var + BN_EPS)
        yhat = yhat * g[None, :, None, None] + be[None, :, None, None]
        return jnp.maximum(yhat, 0.0)

    y = bn_relu(conv(x_nchw, params["w1"], params["b1"]), params["g1"], params["be1"])
    y = bn_relu(conv(y, params["w2"], params["b2"]), params["g2"], params["be2"])
    return y


def init_params(key, in_ch, out_ch):
    ks = jax.random.split(key, 8)
    return {
        "w1": 0.1 * jax.random.normal(ks[0], (out_ch, in_ch, 3, 3), jnp.float32),
        "b1": 0.1 * jax.random.normal(ks[1], (out_ch,), jnp.float32),
        "g1": 1.0 + 0.1 * jax.random.normal(ks[2], (out_ch,), jnp.float32),
        "be1": 0.1 * jax.random.normal(ks[3], (out_ch,), jnp.float32),
        "w2": 0.1 * jax.random.normal(ks[4], (out_ch, out_ch, 3, 3), jnp.float32),
        "b2": 0.1 * jax.random.normal(ks[5], (out_ch,), jnp.float32),
        "g2": 1.0 + 0.1 * jax.random.normal(ks[6], (out_ch,), jnp.float32),
        "be2": 0.1 * jax.random.normal(ks[7], (out_ch,), jnp.float32),
    }


if __name__ == "__main__":
    key = jax.random.PRNGKey(0)
    k_x, k_p = jax.random.split(key)

    B, in_ch, out_ch, H, W = 2, 4, 8, 16, 16
    x = jax.random.normal(k_x, (B, in_ch, H, W), jnp.float32)
    params = init_params(k_p, in_ch, out_ch)

    out = jax.block_until_ready(double_conv_forward(x, params))
    assert out.shape == (B, out_ch, H, W)

    # Loose check vs the pure-f32 PyTorch-equivalent reference (bias included,
    # proving the train-mode-BN bias cancellation) ...
    ref_f32 = _reference_forward(x, params)
    assert jnp.allclose(out, ref_f32, atol=2e-2, rtol=2e-2), "mismatch vs f32 reference"

    # ... and a tight check vs a reference whose conv inputs are cast to bf16
    # exactly like the kernel's MXU operands.
    ref_bf16 = _reference_forward(x, params, mxu_bf16=True)
    assert jnp.allclose(out, ref_bf16, atol=5e-3, rtol=5e-3), "mismatch vs bf16 reference"

    print("KERNEL_OK")
</pallas_src>

<mosaic_0001>
module attributes {stable_mosaic.version = 11 : i64} {
  func.func @_conv_stats_kernel(%arg0: i32, %arg1: memref<1x16x16x4xbf16, #tpu.memory_space<vmem>>, %arg2: memref<9x4x128xbf16, #tpu.memory_space<vmem>>, %arg3: memref<1x256x128xf32, #tpu.memory_space<vmem>>, %arg4: memref<1x2x128xf32, #tpu.memory_space<vmem>>, %arg5: memref<18x32x4xbf16, #tpu.memory_space<vmem>>, %arg6: memref<256x128xf32, #tpu.memory_space<vmem>>) attributes {dimension_semantics = [#tpu.dimension_semantics<parallel>], iteration_bounds = array<i64: 2>, scalar_prefetch = 0 : i64, scratch_operands = 2 : i64, tpu.core_type = #tpu.core_type<tc>, window_params = [{transform_indices = @transform_0, window_bounds = array<i64: 1, 16, 16, 4>}, {pipeline_mode = #tpu.pipeline_mode<synchronous>, transform_indices = @transform_1, window_bounds = array<i64: 9, 4, 128>}, {transform_indices = @transform_2, window_bounds = array<i64: 1, 256, 128>}, {transform_indices = @transform_3, window_bounds = array<i64: 1, 2, 128>}]} {
    %c0 = arith.constant 0 : index
    %c0_0 = arith.constant 0 : index
    %c0_1 = arith.constant 0 : index
    %c0_2 = arith.constant 0 : index
    %0 = vector.load %arg1[%c0, %c0_0, %c0_1, %c0_2] : memref<1x16x16x4xbf16, #tpu.memory_space<vmem>>, vector<1x16x16x4xbf16>
    %1 = vector.shape_cast %0 : vector<1x16x16x4xbf16> to vector<16x16x4xbf16>
    %cst = arith.constant 0.000000e+00 : bf16
    %2 = vector.broadcast %cst : bf16 to vector<1x32x4xbf16>
    %c0_3 = arith.constant 0 : index
    %c0_4 = arith.constant 0 : index
    %c0_5 = arith.constant 0 : index
    %3 = vector.load %arg5[%c0_3, %c0_4, %c0_5] : memref<18x32x4xbf16, #tpu.memory_space<vmem>>, vector<1x32x4xbf16>
    tpu.vector_store %arg5[%c0_3, %c0_4, %c0_5], %2 {strides = array<i32>} : memref<18x32x4xbf16, #tpu.memory_space<vmem>>, vector<1x32x4xbf16>,
    %cst_6 = arith.constant 0.000000e+00 : bf16
    %4 = vector.broadcast %cst_6 : bf16 to vector<1x32x4xbf16>
    %c17 = arith.constant 17 : index
    %c0_7 = arith.constant 0 : index
    %c0_8 = arith.constant 0 : index
    %5 = vector.load %arg5[%c17, %c0_7, %c0_8] : memref<18x32x4xbf16, #tpu.memory_space<vmem>>, vector<1x32x4xbf16>
    tpu.vector_store %arg5[%c17, %c0_7, %c0_8], %4 {strides = array<i32>} : memref<18x32x4xbf16, #tpu.memory_space<vmem>>, vector<1x32x4xbf16>,
    %cst_9 = arith.constant 0.000000e+00 : bf16
    %6 = vector.broadcast %cst_9 : bf16 to vector<18x1x4xbf16>
    %c0_10 = arith.constant 0 : index
    %c0_11 = arith.constant 0 : index
    %c0_12 = arith.constant 0 : index
    %7 = vector.load %arg5[%c0_10, %c0_11, %c0_12] : memref<18x32x4xbf16, #tpu.memory_space<vmem>>, vector<18x1x4xbf16>
    tpu.vector_store %arg5[%c0_10, %c0_11, %c0_12], %6 {strides = array<i32>} : memref<18x32x4xbf16, #tpu.memory_space<vmem>>, vector<18x1x4xbf16>,
    %cst_13 = arith.constant 0.000000e+00 : bf16
    %8 = vector.broadcast %cst_13 : bf16 to vector<18x1x4xbf16>
    %c0_14 = arith.constant 0 : index
    %c17_15 = arith.constant 17 : index
    %c0_16 = arith.constant 0 : index
    %9 = vector.load %arg5[%c0_14, %c17_15, %c0_16] : memref<18x32x4xbf16, #tpu.memory_space<vmem>>, vector<18x1x4xbf16>
    tpu.vector_store %arg5[%c0_14, %c17_15, %c0_16], %8 {strides = array<i32>} : memref<18x32x4xbf16, #tpu.memory_space<vmem>>, vector<18x1x4xbf16>,
    %c1 = arith.constant 1 : index
    %c1_17 = arith.constant 1 : index
    %c0_18 = arith.constant 0 : index
    %10 = vector.load %arg5[%c1, %c1_17, %c0_18] : memref<18x32x4xbf16, #tpu.memory_space<vmem>>, vector<16x16x4xbf16>
    tpu.vector_store %arg5[%c1, %c1_17, %c0_18], %1 {strides = array<i32>} : memref<18x32x4xbf16, #tpu.memory_space<vmem>>, vector<16x16x4xbf16>,
    %cst_19 = arith.constant 0.000000e+00 : f32
    %11 = vector.broadcast %cst_19 : f32 to vector<256x128xf32>
    %c0_20 = arith.constant 0 : index
    %c0_21 = arith.constant 0 : index
    %12 = vector.load %arg6[%c0_20, %c0_21] : memref<256x128xf32, #tpu.memory_space<vmem>>, vector<256x128xf32>
    tpu.vector_store %arg6[%c0_20, %c0_21], %11 {strides = array<i32>} : memref<256x128xf32, #tpu.memory_space<vmem>>, vector<256x128xf32>,
    %c0_22 = arith.constant 0 : index
    %c0_23 = arith.constant 0 : index
    %c0_24 = arith.constant 0 : index
    %13 = vector.load %arg5[%c0_22, %c0_23, %c0_24] : memref<18x32x4xbf16, #tpu.memory_space<vmem>>, vector<16x16x4xbf16>
    %14 = vector.shape_cast %13 : vector<16x16x4xbf16> to vector<256x4xbf16>
    %c0_25 = arith.constant 0 : index
    %c0_26 = arith.constant 0 : index
    %15 = vector.load %arg6[%c0_25, %c0_26] : memref<256x128xf32, #tpu.memory_space<vmem>>, vector<256x128xf32>
    %c0_27 = arith.constant 0 : index
    %c0_28 = arith.constant 0 : index
    %c0_29 = arith.constant 0 : index
    %16 = vector.load %arg2[%c0_27, %c0_28, %c0_29] : memref<9x4x128xbf16, #tpu.memory_space<vmem>>, vector<1x4x128xbf16>
    %17 = vector.shape_cast %16 : vector<1x4x128xbf16> to vector<4x128xbf16>
    %cst_30 = arith.constant dense<0.000000e+00> : vector<256x128xf32>
    %18 = tpu.matmul %14, %17, %cst_30 {dimension_numbers = #tpu.dot_dimension_numbers<[1], [0], [0], [1], [0, 0, 1, 1], [], []>} : vector<256x4xbf16>, vector<4x128xbf16>, vector<256x128xf32> -> vector<256x128xf32>
    %19 = arith.addf %15, %18 : vector<256x128xf32>
    %c0_31 = arith.constant 0 : index
    %c0_32 = arith.constant 0 : index
    %20 = vector.load %arg6[%c0_31, %c0_32] : memref<256x128xf32, #tpu.memory_space<vmem>>, vector<256x128xf32>
    tpu.vector_store %arg6[%c0_31, %c0_32], %19 {strides = array<i32>} : memref<256x128xf32, #tpu.memory_space<vmem>>, vector<256x128xf32>,
    %c0_33 = arith.constant 0 : index
    %c1_34 = arith.constant 1 : index
    %c0_35 = arith.constant 0 : index
    %21 = vector.load %arg5[%c0_33, %c1_34, %c0_35] : memref<18x32x4xbf16, #tpu.memory_space<vmem>>, vector<16x16x4xbf16>
    %22 = vector.shape_cast %21 : vector<16x16x4xbf16> to vector<256x4xbf16>
    %c0_36 = arith.constant 0 : index
    %c0_37 = arith.constant 0 : index
    %23 = vector.load %arg6[%c0_36, %c0_37] : memref<256x128xf32, #tpu.memory_space<vmem>>, vector<256x128xf32>
    %c1_38 = arith.constant 1 : index
    %c0_39 = arith.constant 0 : index
    %c0_40 = arith.constant 0 : index
    %24 = vector.load %arg2[%c1_38, %c0_39, %c0_40] : memref<9x4x128xbf16, #tpu.memory_space<vmem>>, vector<1x4x128xbf16>
    %25 = vector.shape_cast %24 : vector<1x4x128xbf16> to vector<4x128xbf16>
    %cst_41 = arith.constant dense<0.000000e+00> : vector<256x128xf32>
    %26 = tpu.matmul %22, %25, %cst_41 {dimension_numbers = #tpu.dot_dimension_numbers<[1], [0], [0], [1], [0, 0, 1, 1], [], []>} : vector<256x4xbf16>, vector<4x128xbf16>, vector<256x128xf32> -> vector<256x128xf32>
    %27 = arith.addf %23, %26 : vector<256x128xf32>
    %c0_42 = arith.constant 0 : index
    %c0_43 = arith.constant 0 : index
    %28 = vector.load %arg6[%c0_42, %c0_43] : memref<256x128xf32, #tpu.memory_space<vmem>>, vector<256x128xf32>
    tpu.vector_store %arg6[%c0_42, %c0_43], %27 {strides = array<i32>} : memref<256x128xf32, #tpu.memory_space<vmem>>, vector<256x128xf32>,
    %c0_44 = arith.constant 0 : index
    %c2 = arith.constant 2 : index
    %c0_45 = arith.constant 0 : index
    %29 = vector.load %arg5[%c0_44, %c2, %c0_45] : memref<18x32x4xbf16, #tpu.memory_space<vmem>>, vector<16x16x4xbf16>
    %30 = vector.shape_cast %29 : vector<16x16x4xbf16> to vector<256x4xbf16>
    %c0_46 = arith.constant 0 : index
    %c0_47 = arith.constant 0 : index
    %31 = vector.load %arg6[%c0_46, %c0_47] : memref<256x128xf32, #tpu.memory_space<vmem>>, vector<256x128xf32>
    %c2_48 = arith.constant 2 : index
    %c0_49 = arith.constant 0 : index
    %c0_50 = arith.constant 0 : index
    %32 = vector.load %arg2[%c2_48, %c0_49, %c0_50] : memref<9x4x128xbf16, #tpu.memory_space<vmem>>, vector<1x4x128xbf16>
    %33 = vector.shape_cast %32 : vector<1x4x128xbf16> to vector<4x128xbf16>
    %cst_51 = arith.constant dense<0.000000e+00> : vector<256x128xf32>
    %34 = tpu.matmul %30, %33, %cst_51 {dimension_numbers = #tpu.dot_dimension_numbers<[1], [0], [0], [1], [0, 0, 1, 1], [], []>} : vector<256x4xbf16>, vector<4x128xbf16>, vector<256x128xf32> -> vector<256x128xf32>
    %35 = arith.addf %31, %34 : vector<256x128xf32>
    %c0_52 = arith.constant 0 : index
    %c0_53 = arith.constant 0 : index
    %36 = vector.load %arg6[%c0_52, %c0_53] : memref<256x128xf32, #tpu.memory_space<vmem>>, vector<256x128xf32>
    tpu.vector_store %arg6[%c0_52, %c0_53], %35 {strides = array<i32>} : memref<256x128xf32, #tpu.memory_space<vmem>>, vector<256x128xf32>,
    %c1_54 = arith.constant 1 : index
    %c0_55 = arith.constant 0 : index
    %c0_56 = arith.constant 0 : index
    %37 = vector.load %arg5[%c1_54, %c0_55, %c0_56] : memref<18x32x4xbf16, #tpu.memory_space<vmem>>, vector<16x16x4xbf16>
    %38 = vector.shape_cast %37 : vector<16x16x4xbf16> to vector<256x4xbf16>
    %c0_57 = arith.constant 0 : index
    %c0_58 = arith.constant 0 : index
    %39 = vector.load %arg6[%c0_57, %c0_58] : memref<256x128xf32, #tpu.memory_space<vmem>>, vector<256x128xf32>
    %c3 = arith.constant 3 : index
    %c0_59 = arith.constant 0 : index
    %c0_60 = arith.constant 0 : index
    %40 = vector.load %arg2[%c3, %c0_59, %c0_60] : memref<9x4x128xbf16, #tpu.memory_space<vmem>>, vector<1x4x128xbf16>
    %41 = vector.shape_cast %40 : vector<1x4x128xbf16> to vector<4x128xbf16>
    %cst_61 = arith.constant dense<0.000000e+00> : vector<256x128xf32>
    %42 = tpu.matmul %38, %41, %cst_61 {dimension_numbers = #tpu.dot_dimension_numbers<[1], [0], [0], [1], [0, 0, 1, 1], [], []>} : vector<256x4xbf16>, vector<4x128xbf16>, vector<256x128xf32> -> vector<256x128xf32>
    %43 = arith.addf %39, %42 : vector<256x128xf32>
    %c0_62 = arith.constant 0 : index
    %c0_63 = arith.constant 0 : index
    %44 = vector.load %arg6[%c0_62, %c0_63] : memref<256x128xf32, #tpu.memory_space<vmem>>, vector<256x128xf32>
    tpu.vector_store %arg6[%c0_62, %c0_63], %43 {strides = array<i32>} : memref<256x128xf32, #tpu.memory_space<vmem>>, vector<256x128xf32>,
    %c1_64 = arith.constant 1 : index
    %c1_65 = arith.constant 1 : index
    %c0_66 = arith.constant 0 : index
    %45 = vector.load %arg5[%c1_64, %c1_65, %c0_66] : memref<18x32x4xbf16, #tpu.memory_space<vmem>>, vector<16x16x4xbf16>
    %46 = vector.shape_cast %45 : vector<16x16x4xbf16> to vector<256x4xbf16>
    %c0_67 = arith.constant 0 : index
    %c0_68 = arith.constant 0 : index
    %47 = vector.load %arg6[%c0_67, %c0_68] : memref<256x128xf32, #tpu.memory_space<vmem>>, vector<256x128xf32>
    %c4 = arith.constant 4 : index
    %c0_69 = arith.constant 0 : index
    %c0_70 = arith.constant 0 : index
    %48 = vector.load %arg2[%c4, %c0_69, %c0_70] : memref<9x4x128xbf16, #tpu.memory_space<vmem>>, vector<1x4x128xbf16>
    %49 = vector.shape_cast %48 : vector<1x4x128xbf16> to vector<4x128xbf16>
    %cst_71 = arith.constant dense<0.000000e+00> : vector<256x128xf32>
    %50 = tpu.matmul %46, %49, %cst_71 {dimension_numbers = #tpu.dot_dimension_numbers<[1], [0], [0], [1], [0, 0, 1, 1], [], []>} : vector<256x4xbf16>, vector<4x128xbf16>, vector<256x128xf32> -> vector<256x128xf32>
    %51 = arith.addf %47, %50 : vector<256x128xf32>
    %c0_72 = arith.constant 0 : index
    %c0_73 = arith.constant 0 : index
    %52 = vector.load %arg6[%c0_72, %c0_73] : memref<256x128xf32, #tpu.memory_space<vmem>>, vector<256x128xf32>
    tpu.vector_store %arg6[%c0_72, %c0_73], %51 {strides = array<i32>} : memref<256x128xf32, #tpu.memory_space<vmem>>, vector<256x128xf32>,
    %c1_74 = arith.constant 1 : index
    %c2_75 = arith.constant 2 : index
    %c0_76 = arith.constant 0 : index
    %53 = vector.load %arg5[%c1_74, %c2_75, %c0_76] : memref<18x32x4xbf16, #tpu.memory_space<vmem>>, vector<16x16x4xbf16>
    %54 = vector.shape_cast %53 : vector<16x16x4xbf16> to vector<256x4xbf16>
    %c0_77 = arith.constant 0 : index
    %c0_78 = arith.constant 0 : index
    %55 = vector.load %arg6[%c0_77, %c0_78] : memref<256x128xf32, #tpu.memory_space<vmem>>, vector<256x128xf32>
    %c5 = arith.constant 5 : index
    %c0_79 = arith.constant 0 : index
    %c0_80 = arith.constant 0 : index
    %56 = vector.load %arg2[%c5, %c0_79, %c0_80] : memref<9x4x128xbf16, #tpu.memory_space<vmem>>, vector<1x4x128xbf16>
    %57 = vector.shape_cast %56 : vector<1x4x128xbf16> to vector<4x128xbf16>
    %cst_81 = arith.constant dense<0.000000e+00> : vector<256x128xf32>
    %58 = tpu.matmul %54, %57, %cst_81 {dimension_numbers = #tpu.dot_dimension_numbers<[1], [0], [0], [1], [0, 0, 1, 1], [], []>} : vector<256x4xbf16>, vector<4x128xbf16>, vector<256x128xf32> -> vector<256x128xf32>
    %59 = arith.addf %55, %58 : vector<256x128xf32>
    %c0_82 = arith.constant 0 : index
    %c0_83 = arith.constant 0 : index
    %60 = vector.load %arg6[%c0_82, %c0_83] : memref<256x128xf32, #tpu.memory_space<vmem>>, vector<256x128xf32>
    tpu.vector_store %arg6[%c0_82, %c0_83], %59 {strides = array<i32>} : memref<256x128xf32, #tpu.memory_space<vmem>>, vector<256x128xf32>,
    %c2_84 = arith.constant 2 : index
    %c0_85 = arith.constant 0 : index
    %c0_86 = arith.constant 0 : index
    %61 = vector.load %arg5[%c2_84, %c0_85, %c0_86] : memref<18x32x4xbf16, #tpu.memory_space<vmem>>, vector<16x16x4xbf16>
    %62 = vector.shape_cast %61 : vector<16x16x4xbf16> to vector<256x4xbf16>
    %c0_87 = arith.constant 0 : index
    %c0_88 = arith.constant 0 : index
    %63 = vector.load %arg6[%c0_87, %c0_88] : memref<256x128xf32, #tpu.memory_space<vmem>>, vector<256x128xf32>
    %c6 = arith.constant 6 : index
    %c0_89 = arith.constant 0 : index
    %c0_90 = arith.constant 0 : index
    %64 = vector.load %arg2[%c6, %c0_89, %c0_90] : memref<9x4x128xbf16, #tpu.memory_space<vmem>>, vector<1x4x128xbf16>
    %65 = vector.shape_cast %64 : vector<1x4x128xbf16> to vector<4x128xbf16>
    %cst_91 = arith.constant dense<0.000000e+00> : vector<256x128xf32>
    %66 = tpu.matmul %62, %65, %cst_91 {dimension_numbers = #tpu.dot_dimension_numbers<[1], [0], [0], [1], [0, 0, 1, 1], [], []>} : vector<256x4xbf16>, vector<4x128xbf16>, vector<256x128xf32> -> vector<256x128xf32>
    %67 = arith.addf %63, %66 : vector<256x128xf32>
    %c0_92 = arith.constant 0 : index
    %c0_93 = arith.constant 0 : index
    %68 = vector.load %arg6[%c0_92, %c0_93] : memref<256x128xf32, #tpu.memory_space<vmem>>, vector<256x128xf32>
    tpu.vector_store %arg6[%c0_92, %c0_93], %67 {strides = array<i32>} : memref<256x128xf32, #tpu.memory_space<vmem>>, vector<256x128xf32>,
    %c2_94 = arith.constant 2 : index
    %c1_95 = arith.constant 1 : index
    %c0_96 = arith.constant 0 : index
    %69 = vector.load %arg5[%c2_94, %c1_95, %c0_96] : memref<18x32x4xbf16, #tpu.memory_space<vmem>>, vector<16x16x4xbf16>
    %70 = vector.shape_cast %69 : vector<16x16x4xbf16> to vector<256x4xbf16>
    %c0_97 = arith.constant 0 : index
    %c0_98 = arith.constant 0 : index
    %71 = vector.load %arg6[%c0_97, %c0_98] : memref<256x128xf32, #tpu.memory_space<vmem>>, vector<256x128xf32>
    %c7 = arith.constant 7 : index
    %c0_99 = arith.constant 0 : index
    %c0_100 = arith.constant 0 : index
    %72 = vector.load %arg2[%c7, %c0_99, %c0_100] : memref<9x4x128xbf16, #tpu.memory_space<vmem>>, vector<1x4x128xbf16>
    %73 = vector.shape_cast %72 : vector<1x4x128xbf16> to vector<4x128xbf16>
    %cst_101 = arith.constant dense<0.000000e+00> : vector<256x128xf32>
    %74 = tpu.matmul %70, %73, %cst_101 {dimension_numbers = #tpu.dot_dimension_numbers<[1], [0], [0], [1], [0, 0, 1, 1], [], []>} : vector<256x4xbf16>, vector<4x128xbf16>, vector<256x128xf32> -> vector<256x128xf32>
    %75 = arith.addf %71, %74 : vector<256x128xf32>
    %c0_102 = arith.constant 0 : index
    %c0_103 = arith.constant 0 : index
    %76 = vector.load %arg6[%c0_102, %c0_103] : memref<256x128xf32, #tpu.memory_space<vmem>>, vector<256x128xf32>
    tpu.vector_store %arg6[%c0_102, %c0_103], %75 {strides = array<i32>} : memref<256x128xf32, #tpu.memory_space<vmem>>, vector<256x128xf32>,
    %c2_104 = arith.constant 2 : index
    %c2_105 = arith.constant 2 : index
    %c0_106 = arith.constant 0 : index
    %77 = vector.load %arg5[%c2_104, %c2_105, %c0_106] : memref<18x32x4xbf16, #tpu.memory_space<vmem>>, vector<16x16x4xbf16>
    %78 = vector.shape_cast %77 : vector<16x16x4xbf16> to vector<256x4xbf16>
    %c0_107 = arith.constant 0 : index
    %c0_108 = arith.constant 0 : index
    %79 = vector.load %arg6[%c0_107, %c0_108] : memref<256x128xf32, #tpu.memory_space<vmem>>, vector<256x128xf32>
    %c8 = arith.constant 8 : index
    %c0_109 = arith.constant 0 : index
    %c0_110 = arith.constant 0 : index
    %80 = vector.load %arg2[%c8, %c0_109, %c0_110] : memref<9x4x128xbf16, #tpu.memory_space<vmem>>, vector<1x4x128xbf16>
    %81 = vector.shape_cast %80 : vector<1x4x128xbf16> to vector<4x128xbf16>
    %cst_111 = arith.constant dense<0.000000e+00> : vector<256x128xf32>
    %82 = tpu.matmul %78, %81, %cst_111 {dimension_numbers = #tpu.dot_dimension_numbers<[1], [0], [0], [1], [0, 0, 1, 1], [], []>} : vector<256x4xbf16>, vector<4x128xbf16>, vector<256x128xf32> -> vector<256x128xf32>
    %83 = arith.addf %79, %82 : vector<256x128xf32>
    %c0_112 = arith.constant 0 : index
    %c0_113 = arith.constant 0 : index
    %84 = vector.load %arg6[%c0_112, %c0_113] : memref<256x128xf32, #tpu.memory_space<vmem>>, vector<256x128xf32>
    tpu.vector_store %arg6[%c0_112, %c0_113], %83 {strides = array<i32>} : memref<256x128xf32, #tpu.memory_space<vmem>>, vector<256x128xf32>,
    %c0_114 = arith.constant 0 : index
    %c0_115 = arith.constant 0 : index
    %85 = vector.load %arg6[%c0_114, %c0_115] : memref<256x128xf32, #tpu.memory_space<vmem>>, vector<256x128xf32>
    %c0_116 = arith.constant 0 : index
    %c0_117 = arith.constant 0 : index
    %c0_118 = arith.constant 0 : index
    %86 = vector.load %arg3[%c0_116, %c0_117, %c0_118] : memref<1x256x128xf32, #tpu.memory_space<vmem>>, vector<1x256x128xf32>
    %87 = vector.shape_cast %86 : vector<1x256x128xf32> to vector<256x128xf32>
    %88 = vector.shape_cast %85 : vector<256x128xf32> to vector<1x256x128xf32>
    tpu.vector_store %arg3[%c0_116, %c0_117, %c0_118], %88 {strides = array<i32>} : memref<1x256x128xf32, #tpu.memory_space<vmem>>, vector<1x256x128xf32>,
    %cst_119 = arith.constant dense<0.000000e+00> : vector<128xf32>
    %89 = vector.multi_reduction <add>, %85, %cst_119 [0] : vector<256x128xf32> to vector<128xf32>
    %90 = vector.shape_cast %89 : vector<128xf32> to vector<1x128xf32>
    %c0_120 = arith.constant 0 : index
    %c0_121 = arith.constant 0 : index
    %c0_122 = arith.constant 0 : index
    %91 = vector.load %arg4[%c0_120, %c0_121, %c0_122] : memref<1x2x128xf32, #tpu.memory_space<vmem>>, vector<1x1x128xf32>
    %92 = vector.shape_cast %91 : vector<1x1x128xf32> to vector<1x128xf32>
    %93 = vector.shape_cast %90 : vector<1x128xf32> to vector<1x1x128xf32>
    tpu.vector_store %arg4[%c0_120, %c0_121, %c0_122], %93 {strides = array<i32>} : memref<1x2x128xf32, #tpu.memory_space<vmem>>, vector<1x1x128xf32>,
    %94 = arith.mulf %85, %85 : vector<256x128xf32>
    %cst_123 = arith.constant dense<0.000000e+00> : vector<128xf32>
    %95 = vector.multi_reduction <add>, %94, %cst_123 [0] : vector<256x128xf32> to vector<128xf32>
    %96 = vector.shape_cast %95 : vector<128xf32> to vector<1x128xf32>
    %c0_124 = arith.constant 0 : index
    %c1_125 = arith.constant 1 : index
    %c0_126 = arith.constant 0 : index
    %97 = vector.load %arg4[%c0_124, %c1_125, %c0_126] : memref<1x2x128xf32, #tpu.memory_space<vmem>>, vector<1x1x128xf32>
    %98 = vector.shape_cast %97 : vector<1x1x128xf32> to vector<1x128xf32>
    %99 = vector.shape_cast %96 : vector<1x128xf32> to vector<1x1x128xf32>
    tpu.vector_store %arg4[%c0_124, %c1_125, %c0_126], %99 {strides = array<i32>} : memref<1x2x128xf32, #tpu.memory_space<vmem>>, vector<1x1x128xf32>,
    return
  }
  func.func @transform_0(%arg0: i32) -> (i32, i32, i32, i32) {
    %c0_i32 = arith.constant 0 : i32
    %c0_i32_0 = arith.constant 0 : i32
    %c0_i32_1 = arith.constant 0 : i32
    %c0_i32_2 = arith.constant 0 : i32
    return %arg0, %c0_i32, %c0_i32_0, %c0_i32_1 : i32, i32, i32, i32
  }
  func.func @transform_1(%arg0: i32) -> (i32, i32, i32) {
    %c0_i32 = arith.constant 0 : i32
    %c0_i32_0 = arith.constant 0 : i32
    %c0_i32_1 = arith.constant 0 : i32
    %c0_i32_2 = arith.constant 0 : i32
    return %c0_i32, %c0_i32_0, %c0_i32_1 : i32, i32, i32
  }
  func.func @transform_2(%arg0: i32) -> (i32, i32, i32) {
    %c0_i32 = arith.constant 0 : i32
    %c0_i32_0 = arith.constant 0 : i32
    %c0_i32_1 = arith.constant 0 : i32
    return %arg0, %c0_i32, %c0_i32_0 : i32, i32, i32
  }
  func.func @transform_3(%arg0: i32) -> (i32, i32, i32) {
    %c0_i32 = arith.constant 0 : i32
    %c0_i32_0 = arith.constant 0 : i32
    %c0_i32_1 = arith.constant 0 : i32
    return %arg0, %c0_i32, %c0_i32_0 : i32, i32, i32
  }
}

</mosaic_0001>

<bundles_post_ra>
// kernel: tpu_custom_call.1
= control target key start
LH: loop header
LB: loop body
LE: loop exit
PB: predicated region body
PF: predicated region fallthrough
CT: control target
= control target key end

     0   :  { %9 = vsyncpa [#allocation5], 0  ;;  %s6919_s0 = inlined_call_operand.vmem [shape: bf16[2,16,16,4], index: 0, kind: input, shape index: {}]   ;;  %s6920_s1 = inlined_call_operand.vmem [shape: bf16[9,4,128], index: 1, kind: input, shape index: {}]   ;;  %s6921_s2 = inlined_call_operand.hbm [shape: f32[2,256,128], index: 2, kind: output, shape index: {0}]   ;;  %s6922_s3 = inlined_call_operand.hbm [shape: f32[2,2,128], index: 3, kind: output, shape index: {1}]  }
   0x1   :  { %11 = vsyncpa [#allocation5 + $0x1], 0 }
   0x2   :  { %12 = vsyncpa [#allocation7], 0 }
   0x3   :  { %14 = vsyncpa [#allocation7 + $0x1], 0  ;;  %s5931_s12 = smov 0   ;;  %s5933_s13 = smov 0  }
   0x4   :  { %s5935_s14 = smov 0   ;;  %s5937_s15 = smov 0  }
   0x5 LB: > { %s5952_s16 = sadd.s32 4294967295, %s5904_s15   ;;  %s4834_s17 = sadd.s32 4294967294, %s5904_s15   ;;  %s5904_s15 = sphi %s5937_s15, %s6934_s15   ;;  %s5900_s14 = sphi %s5935_s14, %s6933_s14   ;;  %s5896_s13 = sphi %s5933_s13, %s6932_s13   ;;  %s5892_s12 = sphi %s5931_s12, %s6931_s12  }
   0x6   : > { %s5956_s18 = sadd.s32 1, %s5904_s15   ;;  %s74_s19 = sadd.s32 1, %s5900_s14 }
   0x7   : > { %s71_s20 = ssub.s32 %s5904_s15, %s5956_s18  ;;  %p84_p0 = scmp.ne.s32.totalorder %s5900_s14, %s5896_s13 }
   0x8   : > { %p72_p1 = scmp.eq.s32.totalorder %s71_s20, 0  ;;  %p85_p2 = scmp.eq.s32.totalorder %s5952_s16, 1 }
   0x9   : > { %p90_p3 = scmp.ne.s32.totalorder %s5896_s13, %s5892_s12  ;;  %p91_p4 = scmp.eq.s32.totalorder %s4834_s17, 1 }
   0xa   : > { %s5967_s21 = scalar_select %p72_p1, %s5900_s14, %s74_s19  }
   0xb   : > { %p5969_p5 = por %p85_p2, %p84_p0  ;;  %p5973_p6 = por %p91_p4, %p90_p3 }
   0xc   : > { %p4837_p7 = scmp.ge.s32.totalorder %s5904_s15, 1  ;;  %p146_p8 = scmp.lt.s32.totalorder %s5904_s15, 3 }
   0xe   : > { %p147_p9 = pnand %p4837_p7, %p146_p8 }
   0xf   : > { %v735_v0 = vld [vmem:[%s6920_s1] sm:$0x3] (!%p147_p9)  ;;  %vm784_vm0 = vcmask (!%p147_p9), 1041408   ;;  %vm213_vm1 = vcmask (!%p147_p9), 31744   ;;  %vm219_vm2 = vcmask (!%p147_p9), 24576   ;;  %v5906_v2 = vmov (!%p147_p9), 0  }
  0x10   : > { %150 = sbr.rel (%p147_p9) target bundleno = 594 (0x252), region = 28  ;;  %5736 = vmatprep.subr.msk.bf16.mxu1 (!%p147_p9), %vm784_vm0, %v735_v0  ;;  %v786_v1 = vsel (!%p147_p9), %vm784_vm0, %v735_v0, 0  ;;  %214 = vst.msk [vmem:[#allocation2] sm:$0xff] (!%p147_p9), %vm213_vm1, %v5906_v2  ;;  %215 = vst.msk [vmem:[#allocation2 + $0x8] sm:$0xff] (!%p147_p9), %vm213_vm1, %v5906_v2  ;;  %vm220_vm3 = vsmask.f32 (!%p147_p9), 256 }
  0x11   : > { %218 = vst.msk [vmem:[#allocation2 + $0x118] sm:$0xff] (!%p147_p9), %vm213_vm1, %v5906_v2  ;;  %217 = vst.msk [vmem:[#allocation2 + $0x110] sm:$0xff] (!%p147_p9), %vm213_vm1, %v5906_v2  ;;  %p175_p10 = scmp.lt.s32.totalorder (!%p147_p9), %s5952_s16, 1  ;;  %v225_v3 = vld [vmem:[#allocation2 + $0x10] sm:$0x1] (!%p147_p9)  ;;  %5173 = vmatpush3.bf16.msra.mxu1 (!%p147_p9), %v786_v1  ;;  %vm1612_vm9 = vcmask (!%p147_p9), 1046528  }
  0x12   : > { %vm5990_vm4 = vmand (!%p147_p9), %vm219_vm2, %vm220_vm3  ;;  %vm276_vm5 = vsmask.f32 (!%p147_p9), 7938  ;;  %v4925_v5 = vld [vmem:[%s6920_s1 + $0x8] sm:$0x3] (!%p147_p9)  ;;  %v228_v6 = vld [vmem:[#allocation2 + $0x20] sm:$0x1] (!%p147_p9) }
  0x13   : > { %v226_v7 = vsel (!%p147_p9), %vm5990_vm4, 0, %v225_v3  ;;  %vm6002_vm6 = vmand (!%p147_p9), %vm219_vm2, %vm276_vm5  ;;  %5740 = vmatprep.subr.msk.bf16.mxu0 (!%p147_p9), %vm784_vm0, %v4925_v5  ;;  %v6008_v9 = vsel (!%p147_p9), %vm784_vm0, %v4925_v5, 0  ;;  %v229_v10 = vsel (!%p147_p9), %vm5990_vm4, 0, %v228_v6  ;;  %v4874_v11 = vld [vmem:[%s6920_s1 + $0x2] sm:$0x3] (!%p147_p9)  ;;  %s6795_s4 = sand.u32 (!%p147_p9), 1, %s5896_s13  }
  0x14   : > { %227 = vst [vmem:[#allocation2 + $0x10] sm:$0x1] (!%p147_p9), %v226_v7  ;;  %5309 = vmatpush3.bf16.msra.mxu0 (!%p147_p9), %v6008_v9  ;;  %230 = vst [vmem:[#allocation2 + $0x20] sm:$0x1] (!%p147_p9), %v229_v10  ;;  %5737 = vmatprep.subr.msk.bf16.mxu1 (!%p147_p9), %vm784_vm0, %v4874_v11  ;;  %v281_v12 = vld [vmem:[#allocation2 + $0x18] sm:$0x1] (!%p147_p9) }
  0x15   : > { %v6020_v13 = vld [vmem:[%s6920_s1 + $0xa] sm:$0x3] (!%p147_p9)  ;;  %v282_v14 = vsel (!%p147_p9), %vm6002_vm6, 0, %v281_v12  ;;  %v231_v15 = vld [vmem:[#allocation2 + $0x30] sm:$0x1] (!%p147_p9)  ;;  %vm6045_vm7 = vmand (!%p147_p9), %vm213_vm1, %vm276_vm5  ;;  %v1321_v46 = vsel (!%p147_p9), %vm784_vm0, %v4874_v11, 0 }
  0x16   : > { %5742 = vmatprep.subr.msk.bf16.mxu0 (!%p147_p9), %vm784_vm0, %v6020_v13  ;;  %283 = vst [vmem:[#allocation2 + $0x18] sm:$0x1] (!%p147_p9), %v282_v14  ;;  %v232_v16 = vsel (!%p147_p9), %vm5990_vm4, 0, %v231_v15  ;;  %v284_v17 = vld [vmem:[#allocation2 + $0x28] sm:$0x1] (!%p147_p9)  ;;  %v6076_v1 = vsel (!%p147_p9), %vm784_vm0, %v6020_v13, 0 }
  0x17   : > { %s176_s28 = scalar_select %p175_p10, %s5952_s16, 1  ;;  %v234_v18 = vld [vmem:[#allocation2 + $0x40] sm:$0x1]  ;;  %233 = vst [vmem:[#allocation2 + $0x30] sm:$0x1] %v232_v16  ;;  %v285_v20 = vsel %vm6002_vm6, 0, %v284_v17 }
  0x18   : > { %v222_v21 = vld [vmem:[#allocation2] sm:$0x1]  ;;  %286 = vst [vmem:[#allocation2 + $0x28] sm:$0x1] %v285_v20  ;;  %v235_v27 = vsel %vm5990_vm4, 0, %v234_v18  ;;  %s4838_s5 = sshll.u32 %s6795_s4, 8 }
  0x19   : > { %s5017_s6 = sshll.u32 %s176_s28, 7  ;;  %v223_v22 = vsel %vm5990_vm4, 0, %v222_v21  ;;  %236 = vst [vmem:[#allocation2 + $0x40] sm:$0x1] %v235_v27  ;;  %v287_v36 = vld [vmem:[#allocation2 + $0x38] sm:$0x1] }
  0x1a   : > { %s6029_s9 = scalar_lea.vmem %s6919_s0, %s5017_s6  ;;  %224 = vst [vmem:[#allocation2] sm:$0x1] %v223_v22  ;;  %v288_v47 = vsel %vm6002_vm6, 0, %v287_v36  ;;  %vm1045_vm8 = vsmask.f32 7424  ;;  %s6798_s6 = scalar_lea.vmem [#allocation4], %s4838_s5 }
  0x1b   : > { %v5793_v19 = vld [vmem:[%s6029_s9] sm:$0xff]   ;;  %v5794_v25 = vld [vmem:[%s6029_s9 + $0x8] sm:$0xff]   ;;  %v5795_v26 = vld [vmem:[%s6029_s9 + $0x10] sm:$0xff]   ;;  %289 = vst [vmem:[#allocation2 + $0x38] sm:$0x1] %v288_v47  ;;  %s5018_s7 = sshll.u32 %s5952_s16, 12 }
  0x1c   : > { %v413_v23 = vshrl.u32 %v5793_v19, 16  ;;  %v416_v24 = vshll.u32 %v5793_v19, 16  ;;  %v559_v29 = vld [vmem:[#allocation2 + $0x10] sm:$0xff]  ;;  %v420_v30 = vshrl.u32 %v5794_v25, 16  ;;  %v423_v31 = vshll.u32 %v5794_v25, 16  ;;  %v5796_v32 = vld [vmem:[%s6029_s9 + $0x18] sm:$0xff]   ;;  %s6840_s11 = scalar_lea.hbm %s6921_s2, %s5018_s7 }
  0x1d   : > { %v427_v34 = vshrl.u32 %v5795_v26, 16  ;;  %v430_v35 = vshll.u32 %v5795_v26, 16  ;;  %v562_v39 = vld [vmem:[#allocation2 + $0x18] sm:$0x1]  ;;  %v434_v40 = vshrl.u32 %v5796_v32, 16  ;;  %v437_v41 = vshll.u32 %v5796_v32, 16 }
  0x1e   : > { %v415_v28 = vrot.slane %v413_v23, 7  ;;  %v422_v38 = vrot.slane %v420_v30, 7  ;;  %v5797_v42 = vld [vmem:[%s6029_s9 + $0x20] sm:$0xff]   ;;  %v571_v50 = vld [vmem:[#allocation2 + $0x30] sm:$0xff]  ;;  %v290_v62 = vld [vmem:[#allocation2 + $0x48] sm:$0x1] }
  0x1f   : > { %v565_v43 = vld [vmem:[#allocation2 + $0x20] sm:$0xff]  ;;  %v429_v45 = vrot.slane %v427_v34, 7  ;;  %v568_v51 = vld [vmem:[#allocation2 + $0x28] sm:$0x1]  ;;  %v6057_v52 = vrot.slane %v434_v40, 7  ;;  %v441_v57 = vshrl.u32 %v5797_v42, 16 }
  0x20   : > { %v418_v37 = vor.u32 %v416_v24, %v415_v28  ;;  %v563_v44 = vsel %vm5990_vm4, %v415_v28, %v562_v39  ;;  %v425_v49 = vor.u32 %v423_v31, %v422_v38  ;;  %v569_v55 = vsel %vm5990_vm4, %v422_v38, %v568_v51  ;;  %v237_v56 = vld [vmem:[#allocation2 + $0x50] sm:$0x1]  ;;  %v577_v2 = vld [vmem:[#allocation2 + $0x40] sm:$0xff]  ;;  %v5798_v3 = vld [vmem:[%s6029_s9 + $0x28] sm:$0xff]   ;;  %s4727_s8 = sshll.u32 %s6798_s6, 4  ;;  %s4709_s17 = scalar_lea.sflag [#allocation5], %s6795_s4  ;;  %s6842_s8 = int_to_ptr.vmem [resolvable:$true] %s4727_s8 }
  0x21   : > { %564 = vst [vmem:[#allocation2 + $0x18] sm:$0x1] %v563_v44  ;;  %v432_v54 = vor.u32 %v430_v35, %v429_v45  ;;  %v6061_v58 = vld [vmem:[#allocation2] sm:$0xff]  ;;  %570 = vst [vmem:[#allocation2 + $0x28] sm:$0x1] %v569_v55  ;;  %v439_v60 = vor.u32 %v437_v41, %v6057_v52  ;;  %v238_v61 = vsel %vm5990_vm4, 0, %v237_v56 }
  0x22   : > { %v560_v48 = vsel %vm6045_vm7, %v418_v37, %v559_v29  ;;  %v566_v59 = vsel %vm6045_vm7, %v425_v49, %v565_v43  ;;  %5174 = vmatprep.mubr.msk.bf16.mxu1 %vm213_vm1, %v6061_v58  ;;  %239 = vst [vmem:[#allocation2 + $0x50] sm:$0x1] %v238_v61  ;;  %v444_v10 = vshll.u32 %v5797_v42, 16  ;;  %v240_v11 = vld [vmem:[#allocation2 + $0x60] sm:$0x1]  ;;  %v6088_v14 = vrot.slane %v441_v57, 7 }
  0x23   : > { %561 = vst [vmem:[#allocation2 + $0x10] sm:$0xff] %v560_v48  ;;  %v2332_v53 = vshll.u32 %v560_v48, 16  ;;  %567 = vst [vmem:[#allocation2 + $0x20] sm:$0xff] %v566_v59  ;;  %v6072_v63 = vsel %vm6045_vm7, %v432_v54, %v571_v50  ;;  %v2344_v0 = vshll.u32 %v566_v59, 16  ;;  %5175 = vmatmul.mubr.msk.bf16.vlgmr.msra.gmra.mrb[0].mxu1 %vm213_vm1, %v560_v48  ;;  %v2330_v5 = vshrl.u32 %v560_v48, 16  ;;  %v5799_v16 = vld [vmem:[%s6029_s9 + $0x30] sm:$0xff]  }
  0x24   : > { %573 = vst [vmem:[#allocation2 + $0x30] sm:$0xff] %v6072_v63  ;;  %v6083_v7 = vsel %vm6045_vm7, %v439_v60, %v577_v2  ;;  %5178 = vmatprep.mubr.msk.bf16.mxu1 %vm213_vm1, %v566_v59  ;;  %5207 = vmatpush3.bf16.msra.mxu1 %v1321_v46  ;;  %v2342_v12 = vshrl.u32 %v566_v59, 16  ;;  %v2356_v13 = vshll.u32 %v6072_v63, 16  ;;  %v291_v15 = vsel %vm6002_vm6, 0, %v290_v62  ;;  %v293_v19 = vld [vmem:[#allocation2 + $0x58] sm:$0x1] }
  0x25   : > { %v2334_v6 = vrot.slane %v2332_v53, 1  ;;  %579 = vst [vmem:[#allocation2 + $0x40] sm:$0xff] %v6083_v7  ;;  %v2346_v17 = vrot.slane %v2344_v0, 1  ;;  %292 = vst [vmem:[#allocation2 + $0x48] sm:$0x1] %v291_v15  ;;  %v241_v18 = vsel %vm5990_vm4, 0, %v240_v11  ;;  %v446_v22 = vor.u32 %v444_v10, %v6088_v14 }
  0x26   : > { %v574_v21 = vld [vmem:[#allocation2 + $0x38] sm:$0x1]  ;;  %242 = vst [vmem:[#allocation2 + $0x60] sm:$0x1] %v241_v18  ;;  %v448_v23 = vshrl.u32 %v5798_v3, 16  ;;  %v451_v24 = vshll.u32 %v5798_v3, 16 }
  0x27   : > { %v6096_v25 = vor.u32 %v2334_v6, %v2330_v5  ;;  %v575_v27 = vsel %vm5990_vm4, %v429_v45, %v574_v21  ;;  %v243_v28 = vld [vmem:[#allocation2 + $0x70] sm:$0x1]  ;;  %v6101_v29 = vld [vmem:[%s6029_s9 + $0x38] sm:$0xff]   ;;  %v294_v32 = vsel %vm6002_vm6, 0, %v293_v19  ;;  %v455_v35 = vshrl.u32 %v5799_v16, 16  ;;  %v5801_v51 = vld [vmem:[%s6029_s9 + $0x40] sm:$0xff]  }
  0x28   : > { %v2298_v20 = vld [vmem:[#allocation2 + $0x18] sm:$0x1]  ;;  %v2300_v30 = vld [vmem:[#allocation2 + $0x28] sm:$0x1]  ;;  %576 = vst [vmem:[#allocation2 + $0x38] sm:$0x1] %v575_v27  ;;  %v6109_v37 = vor.u32 %v2346_v17, %v2342_v12 }
  0x29   : > { %v2337_v26 = vshll.u32 %v2298_v20, 16  ;;  %v6103_v31 = vrot.slane %v448_v23, 7  ;;  %v244_v34 = vsel %vm5990_vm4, 0, %v243_v28  ;;  %v2349_v38 = vshll.u32 %v2300_v30, 16  ;;  %v583_v39 = vld [vmem:[#allocation2 + $0x50] sm:$0xff]  ;;  %v6135_v57 = vld [vmem:[%s6029_s9 + $0x48] sm:$0xff]  }
  0x2a   : > { %295 = vst [vmem:[#allocation2 + $0x58] sm:$0x1] %v294_v32  ;;  %245 = vst [vmem:[#allocation2 + $0x70] sm:$0x1] %v244_v34  ;;  %v458_v40 = vshll.u32 %v5799_v16, 16  ;;  %v2354_v42 = vshrl.u32 %v6072_v63, 16  ;;  %v6114_v43 = vsel %vm6045_vm7, %v446_v22, %v583_v39 }
  0x2b   : > { %v2339_v36 = vrot.slane %v2337_v26, 1  ;;  %v296_v41 = vld [vmem:[#allocation2 + $0x68] sm:$0x1]  ;;  %v453_v44 = vor.u32 %v451_v24, %v6103_v31  ;;  %5179 = vmatmul.mubr.msk.bf16.gmra.mrb[4].mxu1 %vm213_vm1, %v6072_v63  ;;  %v2351_v47 = vrot.slane %v2349_v38, 1  ;;  %585 = vst [vmem:[#allocation2 + $0x50] sm:$0xff] %v6114_v43  ;;  %v2368_v48 = vshll.u32 %v6083_v7, 16 }
  0x2c   : > { %v297_v45 = vsel %vm6002_vm6, 0, %v296_v41  ;;  %v6125_v49 = vrot.slane %v455_v35, 7  ;;  %v246_v50 = vld [vmem:[#allocation2 + $0x80] sm:$0x1]  ;;  %5182 = vmatprep.mubr.msk.bf16.mxu1 %vm213_vm1, %v6083_v7  ;;  %v2358_v53 = vrot.slane %v2356_v13, 1  ;;  %v462_v56 = vshrl.u32 %v6101_v29, 16 }
  0x2d   : > { %v2340_v46 = vsel %vm1045_vm8, %v6096_v25, %v2339_v36  ;;  %298 = vst [vmem:[#allocation2 + $0x68] sm:$0x1] %v297_v45  ;;  %v580_v54 = vld [vmem:[#allocation2 + $0x48] sm:$0x1]  ;;  %v247_v55 = vsel %vm5990_vm4, 0, %v246_v50  ;;  %v2352_v59 = vsel %vm1045_vm8, %v6109_v37, %v2351_v47  ;;  %v589_v61 = vld [vmem:[#allocation2 + $0x60] sm:$0xff] }
  0x2e   : > { %5310 = vmatprep.mubr.msk.bf16.mxu0 %vm213_vm1, %v2340_v46  ;;  %v581_v60 = vsel %vm5990_vm4, %v6057_v52, %v580_v54  ;;  %v460_v62 = vor.u32 %v458_v40, %v6125_v49  ;;  %248 = vst [vmem:[#allocation2 + $0x80] sm:$0x1] %v247_v55  ;;  %v465_v63 = vshll.u32 %v6101_v29, 16  ;;  %v299_v0 = vld [vmem:[#allocation2 + $0x78] sm:$0x1]  ;;  %v6147_v2 = vsel %vm6045_vm7, %v453_v44, %v589_v61  ;;  %s5810_s19 = scalar_lea.vmem %s6842_s8, 4096 }
  0x2f   : > { %5311 = vmatmul.mubr.msk.bf16.vlgmr.msra.gmra.mrb[0].mxu0 %vm213_vm1, %v2352_v59  ;;  %582 = vst [vmem:[#allocation2 + $0x48] sm:$0x1] %v581_v60  ;;  %v300_v3 = vsel %vm6002_vm6, 0, %v299_v0  ;;  %v249_v5 = vld [vmem:[#allocation2 + $0x90] sm:$0x1]  ;;  %v2366_v6 = vshrl.u32 %v6083_v7, 16  ;;  %v6158_v13 = vor.u32 %v2358_v53, %v2354_v42  ;;  %p5811_p11 = scmp.ne.s32.totalorder %s6842_s8, %s5810_s19 }
  0x30   : > { %5343 = vmatpush3.bf16.msra.mxu0 %v6076_v1  ;;  %v2302_v52 = vld [vmem:[#allocation2 + $0x38] sm:$0x1]  ;;  %v2370_v10 = vrot.slane %v2368_v48, 1  ;;  %591 = vst [vmem:[#allocation2 + $0x60] sm:$0xff] %v6147_v2  ;;  %v6154_v11 = vrot.slane %v462_v56, 7  ;;  %v250_v12 = vsel %vm5990_vm4, 0, %v249_v5 }
  0x31   : > { %301 = vst [vmem:[#allocation2 + $0x78] sm:$0x1] %v300_v3  ;;  %v2361_v15 = vshll.u32 %v2302_v52, 16  ;;  %v586_v16 = vld [vmem:[#allocation2 + $0x58] sm:$0x1]  ;;  %v595_v17 = vld [vmem:[#allocation2 + $0x70] sm:$0xff]  ;;  %p5812_p12 = pnand %p5811_p11, %p5969_p5 }
  0x32   : > { %251 = vst [vmem:[#allocation2 + $0x90] sm:$0x1] %v250_v12  ;;  %v469_v18 = vshrl.u32 %v5801_v51, 16  ;;  %v472_v1 = vshll.u32 %v5801_v51, 16  ;;  %v587_v7 = vsel %vm5990_vm4, %v6088_v14, %v586_v16  ;;  %v6165_v19 = vsel %vm6045_vm7, %v460_v62, %v595_v17  ;;  %v302_v21 = vld [vmem:[#allocation2 + $0x88] sm:$0x1] }
  0x33   : > { %v467_v20 = vor.u32 %v465_v63, %v6154_v11  ;;  %v476_v22 = vshrl.u32 %v6135_v57, 16  ;;  %v2363_v23 = vrot.slane %v2361_v15, 1  ;;  %588 = vst [vmem:[#allocation2 + $0x58] sm:$0x1] %v587_v7  ;;  %v2380_v24 = vshll.u32 %v6114_v43, 16  ;;  %597 = vst [vmem:[#allocation2 + $0x70] sm:$0xff] %v6165_v19  ;;  %5183 = vmatmul.mubr.msk.bf16.gmra.mrb[8].mxu1 %vm213_vm1, %v6114_v43  ;;  %p5813_p13 = pneg %p5812_p12 }
  0x34   : > { %v592_v26 = vld [vmem:[#allocation2 + $0x68] sm:$0x1]  ;;  %v6171_v27 = vrot.slane %v469_v18, 7  ;;  %v2392_v28 = vshll.u32 %v6147_v2, 16  ;;  %v303_v29 = vsel %vm6002_vm6, 0, %v302_v21  ;;  %5186 = vmatprep.mubr.msk.bf16.mxu1 %vm213_vm1, %v6147_v2  ;;  %v6189_v38 = vor.u32 %v2370_v10, %v2366_v6  ;;  %v5803_v42 = vld [vmem:[%s6029_s9 + $0x50] sm:$0xff]  }
  0x35   : > { %v593_v14 = vsel %vm5990_vm4, %v6103_v31, %v592_v26  ;;  %v252_v30 = vld [vmem:[#allocation2 + $0xa0] sm:$0x1]  ;;  %v2364_v32 = vsel %vm1045_vm8, %v6158_v13, %v2363_v23  ;;  %304 = vst [vmem:[#allocation2 + $0x88] sm:$0x1] %v303_v29  ;;  %v6195_v40 = vrot.slane %v476_v22, 7  ;;  %v479_v41 = vshll.u32 %v6135_v57, 16 }
  0x36   : > { %594 = vst [vmem:[#allocation2 + $0x68] sm:$0x1] %v593_v14  ;;  %v601_v34 = vld [vmem:[#allocation2 + $0x80] sm:$0xff]  ;;  %v474_v35 = vor.u32 %v472_v1, %v6171_v27  ;;  %v253_v31 = vsel %vm5990_vm4, 0, %v252_v30  ;;  %5314 = vmatprep.mubr.msk.bf16.mxu0 %vm213_vm1, %v2364_v32  ;;  %v2304_v36 = vld [vmem:[#allocation2 + $0x48] sm:$0x1] }
  0x37   : > { %v6193_v39 = vsel %vm6045_vm7, %v467_v20, %v601_v34  ;;  %254 = vst [vmem:[#allocation2 + $0xa0] sm:$0x1] %v253_v31  ;;  %v2373_v44 = vshll.u32 %v2304_v36, 16  ;;  %v2378_v45 = vshrl.u32 %v6114_v43, 16  ;;  %v2382_v46 = vrot.slane %v2380_v24, 1  ;;  %v5804_v62 = vld [vmem:[%s6029_s9 + $0x58] sm:$0xff]  }
  0x38   : > { %v2390_v47 = vshrl.u32 %v6147_v2, 16  ;;  %603 = vst [vmem:[#allocation2 + $0x80] sm:$0xff] %v6193_v39  ;;  %v598_v48 = vld [vmem:[#allocation2 + $0x78] sm:$0x1]  ;;  %v2394_v50 = vrot.slane %v2392_v28, 1  ;;  %v2404_v43 = vshll.u32 %v6165_v19, 16  ;;  %v481_v59 = vor.u32 %v479_v41, %v6195_v40 }
  0x39   : > { %v599_v51 = vsel %vm5990_vm4, %v6125_v49, %v598_v48  ;;  %v607_v53 = vld [vmem:[#allocation2 + $0x90] sm:$0xff]  ;;  %v6208_v54 = vld [vmem:[%s6920_s1 + $0xc] sm:$0x3]  ;;  %v2375_v55 = vrot.slane %v2373_v44, 1  ;;  %v483_v61 = vshrl.u32 %v5803_v42, 16  ;;  %v6224_v0 = vor.u32 %v2382_v46, %v2378_v45  ;;  %v6227_v5 = vld [vmem:[%s6029_s9 + $0x60] sm:$0xff]  }
  0x3a   : > { %600 = vst [vmem:[#allocation2 + $0x78] sm:$0x1] %v599_v51  ;;  %v6213_v56 = vsel %vm6045_vm7, %v474_v35, %v607_v53  ;;  %5743 = vmatprep.subr.msk.bf16.mxu0 %vm784_vm0, %v6208_v54  ;;  %v255_v57 = vld [vmem:[#allocation2 + $0xb0] sm:$0x1]  ;;  %v2306_v49 = vld [vmem:[#allocation2 + $0x58] sm:$0x1]  ;;  %v6232_v6 = vor.u32 %v2394_v50, %v2390_v47 }
  0x3b   : > { %609 = vst [vmem:[#allocation2 + $0x90] sm:$0xff] %v6213_v56  ;;  %v256_v60 = vsel %vm5990_vm4, 0, %v255_v57  ;;  %v2376_v63 = vsel %vm1045_vm8, %v6189_v38, %v2375_v55  ;;  %v2385_v2 = vshll.u32 %v2306_v49, 16  ;;  %v486_v3 = vshll.u32 %v5803_v42, 16  ;;  %5187 = vmatmul.mubr.msk.bf16.gmra.mrb[12].mxu1 %vm213_vm1, %v6165_v19  ;;  %v258_v21 = vld [vmem:[#allocation2 + $0xc0] sm:$0x1] }
  0x3c   : > { %257 = vst [vmem:[#allocation2 + $0xb0] sm:$0x1] %v256_v60  ;;  %5315 = vmatmul.mubr.msk.bf16.gmra.mrb[4].mxu0 %vm213_vm1, %v2376_v63  ;;  %v2402_v10 = vshrl.u32 %v6165_v19, 16  ;;  %v604_v12 = vld [vmem:[#allocation2 + $0x88] sm:$0x1]  ;;  %v6235_v15 = vrot.slane %v483_v61, 7  ;;  %5190 = vmatprep.mubr.msk.bf16.mxu1 %vm213_vm1, %v6193_v39 }
  0x3d   : > { %v2308_v52 = vld [vmem:[#allocation2 + $0x68] sm:$0x1]  ;;  %v2387_v16 = vrot.slane %v2385_v2, 1  ;;  %v2406_v18 = vrot.slane %v2404_v43, 1  ;;  %v605_v1 = vsel %vm5990_vm4, %v6154_v11, %v604_v12  ;;  %v2416_v20 = vshll.u32 %v6193_v39, 16  ;;  %v5807_v47 = vld [vmem:[%s6029_s9 + $0x70] sm:$0xff]  }
  0x3e   : > { %v2397_v17 = vshll.u32 %v2308_v52, 16  ;;  %v613_v7 = vld [vmem:[#allocation2 + $0xa0] sm:$0xff]  ;;  %606 = vst [vmem:[#allocation2 + $0x88] sm:$0x1] %v605_v1  ;;  %v490_v22 = vshrl.u32 %v5804_v62, 16  ;;  %v488_v26 = vor.u32 %v486_v3, %v6235_v15  ;;  %v259_v11 = vsel %vm5990_vm4, 0, %v258_v21 }
  0x3f   : > { %v6245_v19 = vsel %vm6045_vm7, %v481_v59, %v613_v7  ;;  %v2388_v23 = vsel %vm1045_vm8, %v6224_v0, %v2387_v16  ;;  %v2831_v28 = vld [vmem:[#allocation2 + $0x10] sm:$0xfe]  ;;  %v2832_v29 = vld [vmem:[#allocation2 + $0x18] sm:$0x1]  ;;  %260 = vst [vmem:[#allocation2 + $0xc0] sm:$0x1] %v259_v11  ;;  %v6260_v36 = vor.u32 %v2406_v18, %v2402_v10 }
  0x40   : > { %v2399_v24 = vrot.slane %v2397_v17, 1  ;;  %615 = vst [vmem:[#allocation2 + $0xa0] sm:$0xff] %v6245_v19  ;;  %5318 = vmatprep.mubr.msk.bf16.mxu0 %vm213_vm1, %v2388_v23  ;;  %v6254_v30 = vrot.slane %v490_v22, 7  ;;  %v493_v32 = vshll.u32 %v5804_v62, 16  ;;  %v497_v34 = vshrl.u32 %v6227_v5, 16  ;;  %v5806_v35 = vld [vmem:[%s6029_s9 + $0x68] sm:$0xff]  }
  0x41   : > { %v2310_v14 = vld [vmem:[#allocation2 + $0x78] sm:$0x1]  ;;  %v2414_v42 = vshrl.u32 %v6193_v39, 16  ;;  %v2418_v44 = vrot.slane %v2416_v20, 1  ;;  %v261_v46 = vld [vmem:[#allocation2 + $0xd0] sm:$0x1] }
  0x42   : > { %v2400_v31 = vsel %vm1045_vm8, %v6232_v6, %v2399_v24  ;;  %v2409_v41 = vshll.u32 %v2310_v14, 16  ;;  %v262_v51 = vsel %vm5990_vm4, 0, %v261_v46  ;;  %v500_v53 = vshll.u32 %v6227_v5, 16  ;;  %v264_v62 = vld [vmem:[#allocation2 + $0xe0] sm:$0x1]  ;;  %s5907_s20 = smov [#allocation4]  }
  0x43   : > { %v619_v45 = vld [vmem:[#allocation2 + $0xb0] sm:$0xff]  ;;  %5191 = vmatmul.mubr.msk.bf16.gmra.mrb[16].mxu1 %vm213_vm1, %v6213_v56  ;;  %v495_v55 = vor.u32 %v493_v32, %v6254_v30  ;;  %263 = vst [vmem:[#allocation2 + $0xd0] sm:$0x1] %v262_v51  ;;  %v6276_v43 = vrot.slane %v497_v34, 7  ;;  %v504_v57 = vshrl.u32 %v5806_v35, 16  ;;  %v2895_v60 = vrot.slane %v2831_v28, 1 }
  0x44   : > { %v2411_v48 = vrot.slane %v2409_v41, 1  ;;  %v6266_v50 = vsel %vm6045_vm7, %v488_v26, %v619_v45  ;;  %5319 = vmatmul.mubr.msk.bf16.gmra.mrb[8].mxu0 %vm213_vm1, %v2400_v31  ;;  %5194 = vmatprep.mubr.msk.bf16.mxu1 %vm213_vm1, %v6245_v19  ;;  %v2896_v61 = vrot.slane %v2832_v29, 1  ;;  %v6283_v63 = vor.u32 %v2418_v44, %v2414_v42  ;;  %v2833_v17 = vld [vmem:[#allocation2 + $0x20] sm:$0xfe]  ;;  %v267_v7 = vld [vmem:[#allocation2 + $0xf0] sm:$0x1] }
  0x45   : > { %621 = vst [vmem:[#allocation2 + $0xb0] sm:$0xff] %v6266_v50  ;;  %v2312_v59 = vld [vmem:[#allocation2 + $0x88] sm:$0x1]  ;;  %v265_v3 = vsel %vm5990_vm4, 0, %v264_v62  ;;  %v511_v5 = vshrl.u32 %v5807_v47, 16  ;;  %v6287_v10 = vrot.slane %v504_v57, 7  ;;  %v502_v1 = vor.u32 %v500_v53, %v6276_v43 }
  0x46   : > { %v2412_v49 = vsel %vm1045_vm8, %v6260_v36, %v2411_v48  ;;  %v2421_v2 = vshll.u32 %v2312_v59, 16  ;;  %v625_v52 = vld [vmem:[#allocation2 + $0xc0] sm:$0xff]  ;;  %266 = vst [vmem:[#allocation2 + $0xe0] sm:$0x1] %v265_v3  ;;  %v507_v12 = vshll.u32 %v5806_v35, 16  ;;  %v268_v22 = vsel %vm5990_vm4, 0, %v267_v7 }
  0x47   : > { %5322 = vmatprep.mubr.msk.bf16.mxu0 %vm213_vm1, %v2412_v49  ;;  %v6291_v18 = vsel %vm6045_vm7, %v495_v55, %v625_v52  ;;  %v2834_v20 = vld [vmem:[#allocation2 + $0x28] sm:$0x1]  ;;  %v2835_v21 = vld [vmem:[#allocation2 + $0x30] sm:$0xfe]  ;;  %v2897_v24 = vsel %vm1612_vm9, %v2895_v60, %v2896_v61  ;;  %v2836_v26 = vld [vmem:[#allocation2 + $0x38] sm:$0x1] }
  0x48   : > { %v2423_v16 = vrot.slane %v2421_v2, 1  ;;  %627 = vst [vmem:[#allocation2 + $0xc0] sm:$0xff] %v6291_v18  ;;  %269 = vst [vmem:[#allocation2 + $0xf0] sm:$0x1] %v268_v22  ;;  %v6300_v11 = vrot.slane %v511_v5, 7  ;;  %v514_v14 = vshll.u32 %v5807_v47, 16  ;;  %v509_v32 = vor.u32 %v507_v12, %v6287_v10 }
  0x49   : > { %v278_v28 = vld [vmem:[#allocation2 + $0x8] sm:$0x1]  ;;  %v2898_v31 = vrot.slane %v2833_v17, 1  ;;  %v2899_v41 = vrot.slane %v2834_v20, 1  ;;  %v2901_v42 = vrot.slane %v2835_v21, 1  ;;  %v2902_v44 = vrot.slane %v2836_v26, 1 }
  0x4a   : > { %v2424_v23 = vsel %vm1045_vm8, %v6283_v63, %v2423_v16  ;;  %v631_v29 = vld [vmem:[#allocation2 + $0xd0] sm:$0xff]  ;;  %v279_v34 = vsel %vm6002_vm6, 0, %v278_v28  ;;  %v516_v46 = vor.u32 %v514_v14, %v6300_v11  ;;  %v1049_v47 = vshll.u32 %v6061_v58, 16  ;;  %v6325_v51 = vld [vmem:[%s6920_s1 + $0x4] sm:$0x3]  ;;  %s5814_s24 = sshll.u32 %s5907_s20, 4  ;;  %s5815_s24 = int_to_ptr.vmem [resolvable:$false] %s5814_s24 }
  0x4b   : > { %5195 = vmatmul.mubr.msk.bf16.gmra.mrb[20].mxu1 %vm213_vm1, %v6266_v50  ;;  %v6310_v35 = vsel %vm6045_vm7, %v502_v1, %v631_v29  ;;  %280 = vst [vmem:[#allocation2 + $0x8] sm:$0x1] %v279_v34  ;;  %v305_v53 = vld [vmem:[#allocation2 + $0x98] sm:$0x1]  ;;  %v2837_v55 = vld [vmem:[#allocation2 + $0x40] sm:$0xfe]  ;;  %5738 = vmatprep.subr.msk.bf16.mxu1 %vm784_vm0, %v6325_v51  ;;  %v2900_v49 = vsel %vm1612_vm9, %v2898_v31, %v2899_v41  ;;  %p5817_p0 = scmp.lt.s32.totalorder %s6842_s8, %s5815_s24 }
  0x4c   : > { %5323 = vmatmul.mubr.msk.bf16.gmra.mrb[12].mxu0 %vm213_vm1, %v2424_v23  ;;  %5198 = vmatprep.mubr.msk.bf16.mxu1 %vm213_vm1, %v6291_v18  ;;  %633 = vst [vmem:[#allocation2 + $0xd0] sm:$0xff] %v6310_v35  ;;  %v306_v57 = vsel %vm6002_vm6, 0, %v305_v53  ;;  %v3353_v59 = vsel %vm784_vm0, %v6208_v54, 0  ;;  %v2903_v60 = vsel %vm1612_vm9, %v2901_v42, %v2902_v44  ;;  %v2838_v61 = vld [vmem:[#allocation2 + $0x48] sm:$0x1]  ;;  %v1047_v52 = vshrl.u32 %v6061_v58, 16 }
  0x4d   : > { %5344 = vmatprep.mubr.msk.bf16.mxu0 %vm213_vm1, %v2897_v24  ;;  %v637_v45 = vld [vmem:[#allocation2 + $0xe0] sm:$0xff]  ;;  %307 = vst [vmem:[#allocation2 + $0x98] sm:$0x1] %v306_v57  ;;  %v308_v2 = vld [vmem:[#allocation2 + $0xa8] sm:$0x1]  ;;  %v1051_v12 = vrot.slane %v1049_v47, 1 }
  0x4e   : > { %v6320_v48 = vsel %vm6045_vm7, %v509_v32, %v637_v45  ;;  %v2839_v3 = vld [vmem:[#allocation2 + $0x50] sm:$0xfe]  ;;  %v309_v16 = vsel %vm6002_vm6, 0, %v308_v2  ;;  %v2840_v17 = vld [vmem:[#allocation2 + $0x58] sm:$0x1]  ;;  %v2904_v58 = vrot.slane %v2837_v55, 1 }
  0x4f   : > { %639 = vst [vmem:[#allocation2 + $0xe0] sm:$0xff] %v6320_v48  ;;  %v643_v62 = vld [vmem:[#allocation2 + $0xf0] sm:$0xff]  ;;  %310 = vst [vmem:[#allocation2 + $0xa8] sm:$0x1] %v309_v16  ;;  %v311_v7 = vld [vmem:[#allocation2 + $0xb8] sm:$0x1]  ;;  %v1052_v26 = vor.u32 %v1051_v12, %v1047_v52 }
  0x50   : > { %v6338_v5 = vsel %vm6045_vm7, %v516_v46, %v643_v62  ;;  %v2905_v20 = vrot.slane %v2838_v61, 1  ;;  %v2907_v21 = vrot.slane %v2839_v3, 1  ;;  %v1016_v22 = vld [vmem:[#allocation2 + $0x18] sm:$0x1]  ;;  %v312_v23 = vsel %vm6002_vm6, 0, %v311_v7  ;;  %s5816_s25 = scalar_lea.vmem %s5815_s24, 8192 }
  0x51   : > { %645 = vst [vmem:[#allocation2 + $0xf0] sm:$0xff] %v6338_v5  ;;  %v2908_v24 = vrot.slane %v2840_v17, 1  ;;  %v1018_v28 = vld [vmem:[#allocation2 + $0x28] sm:$0x1]  ;;  %313 = vst [vmem:[#allocation2 + $0xb8] sm:$0x1] %v312_v23  ;;  %p5818_p1 = scmp.lt.s32.totalorder %s5816_s25, %s5810_s19 }
  0x52   : > { %v1014_v54 = vld [vmem:[#allocation2 + $0x8] sm:$0x1]  ;;  %v2841_v32 = vld [vmem:[#allocation2 + $0x60] sm:$0xfe]  ;;  %v317_v31 = vld [vmem:[#allocation2 + $0xd8] sm:$0x1]  ;;  %v2906_v46 = vsel %vm1612_vm9, %v2904_v58, %v2905_v20 }
  0x53   : > { %5199 = vmatmul.mubr.msk.bf16.gmra.mrb[24].mxu1 %vm213_vm1, %v6310_v35  ;;  %v1054_v1 = vshll.u32 %v1014_v54, 16  ;;  %v314_v29 = vld [vmem:[#allocation2 + $0xc8] sm:$0x1]  ;;  %v1066_v42 = vshll.u32 %v1016_v22, 16  ;;  %v318_v45 = vsel %vm6002_vm6, 0, %v317_v31  ;;  %v1078_v53 = vshll.u32 %v1018_v28, 16  ;;  %p5819_p2 = por %p5818_p1, %p5817_p0 }
  0x54   : > { %5345 = vmatmul.mubr.msk.bf16.vlgmr.msra.gmra.mrb[0].mxu0 %vm213_vm1, %v2900_v49  ;;  %5202 = vmatprep.mubr.msk.bf16.mxu1 %vm213_vm1, %v6320_v48  ;;  %v315_v34 = vsel %vm6002_vm6, 0, %v314_v29  ;;  %v2842_v41 = vld [vmem:[#allocation2 + $0x68] sm:$0x1]  ;;  %v610_v44 = vld [vmem:[#allocation2 + $0x98] sm:$0x1]  ;;  %v2910_v2 = vrot.slane %v2841_v32, 1 }
  0x55   : > { %5377 = vmatpush3.bf16.msra.mxu0 %v3353_v59  ;;  %5348 = vmatprep.mubr.msk.bf16.mxu0 %vm213_vm1, %v2903_v60  ;;  %v1056_v14 = vrot.slane %v1054_v1, 1  ;;  %316 = vst [vmem:[#allocation2 + $0xc8] sm:$0x1] %v315_v34  ;;  %v2843_v47 = vld [vmem:[#allocation2 + $0x70] sm:$0xfe]  ;;  %v611_v55 = vsel %vm5990_vm4, %v6171_v27, %v610_v44  ;;  %v6361_v49 = vld [vmem:[%s6029_s9 + $0x78] sm:$0xff]   ;;  %v2909_v59 = vsel %vm1612_vm9, %v2907_v21, %v2908_v24  ;;  %p5820_p3 = pnand %p5819_p2, %p5813_p13 }
  0x56   : > { %319 = vst [vmem:[#allocation2 + $0xd8] sm:$0x1] %v318_v45  ;;  %v320_v57 = vld [vmem:[#allocation2 + $0xe8] sm:$0x1]  ;;  %v2844_v61 = vld [vmem:[#allocation2 + $0x78] sm:$0x1] }
  0x57   : > { %v1057_v60 = vsel %vm1045_vm8, %v1052_v26, %v1056_v14  ;;  %612 = vst [vmem:[#allocation2 + $0x98] sm:$0x1] %v611_v55  ;;  %v616_v62 = vld [vmem:[#allocation2 + $0xa8] sm:$0x1]  ;;  %v2911_v3 = vrot.slane %v2842_v41, 1  ;;  %v321_v27 = vsel %vm6002_vm6, 0, %v320_v57 }
  0x58   : > { %v617_v52 = vsel %vm5990_vm4, %v6195_v40, %v616_v62  ;;  %v2913_v12 = vrot.slane %v2843_v47, 1  ;;  %v1068_v16 = vrot.slane %v1066_v42, 1  ;;  %v1020_v17 = vld [vmem:[#allocation2 + $0x38] sm:$0x1]  ;;  %322 = vst [vmem:[#allocation2 + $0xe8] sm:$0x1] %v321_v27 }
  0x59   : > { %618 = vst [vmem:[#allocation2 + $0xa8] sm:$0x1] %v617_v52  ;;  %v323_v54 = vld [vmem:[#allocation2 + $0xf8] sm:$0x1]  ;;  %v2914_v1 = vrot.slane %v2844_v61, 1  ;;  %v1080_v40 = vrot.slane %v1078_v53, 1  ;;  %v2912_v23 = vsel %vm1612_vm9, %v2910_v2, %v2911_v3 }
  0x5a   : > { %v622_v7 = vld [vmem:[#allocation2 + $0xb8] sm:$0x1]  ;;  %v324_v58 = vsel %vm6002_vm6, 0, %v323_v54  ;;  %v518_v20 = vshrl.u32 %v6361_v49, 16  ;;  %v1022_v21 = vld [vmem:[#allocation2 + $0x48] sm:$0x1]  ;;  %v1069_v29 = vsel %vm1045_vm8, %v6096_v25, %v1068_v16 }
  0x5b   : > { %5203 = vmatmul.mubr.msk.bf16.gmra.mrb[28].mxu1 %vm213_vm1, %v6338_v5  ;;  %v623_v22 = vsel %vm5990_vm4, %v6235_v15, %v622_v7  ;;  %325 = vst [vmem:[#allocation2 + $0xf8] sm:$0x1] %v324_v58  ;;  %v2845_v24 = vld [vmem:[#allocation2 + $0x80] sm:$0xfe]  ;;  %v270_v14 = vld [vmem:[#allocation2 + $0x100] sm:$0x1]  ;;  %v1081_v47 = vsel %vm1045_vm8, %v6109_v37, %v1080_v40 }
  0x5c   : > { %5349 = vmatmul.mubr.msk.bf16.gmra.mrb[4].mxu0 %vm213_vm1, %v2906_v46  ;;  %5208 = vmatprep.mubr.msk.bf16.mxu1 %vm213_vm1, %v1057_v60  ;;  %624 = vst [vmem:[#allocation2 + $0xb8] sm:$0x1] %v623_v22  ;;  %v628_v26 = vld [vmem:[#allocation2 + $0xc8] sm:$0x1]  ;;  %v271_v31 = vsel %vm5990_vm4, 0, %v270_v14  ;;  %v1090_v44 = vshll.u32 %v1020_v17, 16  ;;  %v2915_v46 = vsel %vm1612_vm9, %v2913_v12, %v2914_v1 }
  0x5d   : > { %5352 = vmatprep.mubr.msk.bf16.mxu0 %vm213_vm1, %v2909_v59  ;;  %v326_v28 = vld [vmem:[#allocation2 + $0x108] sm:$0x1]  ;;  %v629_v32 = vsel %vm5990_vm4, %v6254_v30, %v628_v26  ;;  %v634_v34 = vld [vmem:[#allocation2 + $0xd8] sm:$0x1]  ;;  %v6394_v41 = vld [vmem:[%s6920_s1 + $0xe] sm:$0x3] }
  0x5e   : > { %v327_v15 = vsel %vm6002_vm6, 0, %v326_v28  ;;  %v2846_v42 = vld [vmem:[#allocation2 + $0x88] sm:$0x1]  ;;  %630 = vst [vmem:[#allocation2 + $0xc8] sm:$0x1] %v629_v32  ;;  %v635_v25 = vsel %vm5990_vm4, %v6276_v43, %v634_v34  ;;  %v520_v30 = vrot.slane %v518_v20, 7  ;;  %5744 = vmatprep.subr.msk.bf16.mxu0 %vm784_vm0, %v6394_v41 }
  0x5f   : > { %272 = vst [vmem:[#allocation2 + $0x100] sm:$0x1] %v271_v31  ;;  %328 = vst [vmem:[#allocation2 + $0x108] sm:$0x1] %v327_v15  ;;  %v521_v45 = vshll.u32 %v6361_v49, 16  ;;  %v1102_v55 = vshll.u32 %v1022_v21, 16 }
  0x60   : > { %v2847_v53 = vld [vmem:[#allocation2 + $0x90] sm:$0xfe]  ;;  %636 = vst [vmem:[#allocation2 + $0xd8] sm:$0x1] %v635_v25  ;;  %v2848_v57 = vld [vmem:[#allocation2 + $0x98] sm:$0x1] }
  0x61   : > { %v1744_v43 = vsel %vm784_vm0, %v6325_v51, 0  ;;  %v640_v59 = vld [vmem:[#allocation2 + $0xe8] sm:$0x1]  ;;  %v2916_v49 = vrot.slane %v2845_v24, 1  ;;  %v2917_v60 = vrot.slane %v2846_v42, 1  ;;  %v1092_v37 = vrot.slane %v1090_v44, 1 }
  0x62   : > { %v641_v61 = vsel %vm5990_vm4, %v6287_v10, %v640_v59  ;;  %v646_v62 = vld [vmem:[#allocation2 + $0xf8] sm:$0x1]  ;;  %v523_v2 = vor.u32 %v521_v45, %v520_v30  ;;  %v2919_v51 = vrot.slane %v2847_v53, 1  ;;  %v2920_v3 = vrot.slane %v2848_v57, 1  ;;  %v1026_v16 = vld [vmem:[#allocation2 + $0x68] sm:$0x1] }
  0x63   : > { %5209 = vmatmul.mubr.msk.bf16.vlgmr.msra.gmra.mrb[0].mxu1 %vm213_vm1, %v1069_v29  ;;  %642 = vst [vmem:[#allocation2 + $0xe8] sm:$0x1] %v641_v61  ;;  %v1104_v52 = vrot.slane %v1102_v55, 1  ;;  %v1024_v27 = vld [vmem:[#allocation2 + $0x58] sm:$0x1]  ;;  %v647_v12 = vsel %vm5990_vm4, %v6300_v11, %v646_v62  ;;  %v2918_v10 = vsel %vm1612_vm9, %v2916_v49, %v2917_v60  ;;  %v1093_v1 = vsel %vm1045_vm8, %v6158_v13, %v1092_v37 }
  0x64   : > { %5353 = vmatmul.mubr.msk.bf16.gmra.mrb[8].mxu0 %vm213_vm1, %v2912_v23  ;;  %5212 = vmatprep.mubr.msk.bf16.mxu1 %vm213_vm1, %v1081_v47  ;;  %648 = vst [vmem:[#allocation2 + $0xf8] sm:$0x1] %v647_v12  ;;  %v1114_v40 = vshll.u32 %v1024_v27, 16  ;;  %v2921_v20 = vsel %vm1612_vm9, %v2919_v51, %v2920_v3  ;;  %v2849_v11 = vld [vmem:[#allocation2 + $0xa0] sm:$0xfe]  ;;  %v1126_v23 = vshll.u32 %v1026_v16, 16 }
  0x65   : > { %5356 = vmatprep.mubr.msk.bf16.mxu0 %vm213_vm1, %v2915_v46  ;;  %5241 = vmatpush3.bf16.msra.mxu1 %v1744_v43  ;;  %v2850_v21 = vld [vmem:[#allocation2 + $0xa8] sm:$0x1]  ;;  %v1105_v22 = vsel %vm1045_vm8, %v6189_v38, %v1104_v52  ;;  %v2851_v13 = vld [vmem:[#allocation2 + $0xb0] sm:$0xfe]  ;;  %v2852_v24 = vld [vmem:[#allocation2 + $0xb8] sm:$0x1] }
  0x66   : > { %v649_v17 = vld [vmem:[#allocation2 + $0x100] sm:$0xff]  ;;  %v652_v54 = vld [vmem:[#allocation2 + $0x108] sm:$0x1]  ;;  %v2922_v33 = vrot.slane %v2849_v11, 1  ;;  %v2923_v26 = vrot.slane %v2850_v21, 1  ;;  %v1116_v14 = vrot.slane %v1114_v40, 1 }
  0x67   : > { %v6422_v7 = vsel %vm6045_vm7, %v523_v2, %v649_v17  ;;  %v653_v58 = vsel %vm5990_vm4, %v520_v30, %v652_v54  ;;  %v6437_v38 = vld [vmem:[%s6920_s1 + $0x6] sm:$0x3]  ;;  %v2925_v28 = vrot.slane %v2851_v13, 1  ;;  %v2926_v29 = vrot.slane %v2852_v24, 1  ;;  %v1028_v34 = vld [vmem:[#allocation2 + $0x78] sm:$0x1] }
  0x68   : > { %651 = vst [vmem:[#allocation2 + $0x100] sm:$0xff] %v6422_v7  ;;  %654 = vst [vmem:[#allocation2 + $0x108] sm:$0x1] %v653_v58  ;;  %v1128_v32 = vrot.slane %v1126_v23, 1  ;;  %5739 = vmatprep.subr.msk.bf16.mxu1 %vm784_vm0, %v6437_v38  ;;  %v1030_v31 = vld [vmem:[#allocation2 + $0x88] sm:$0x1]  ;;  %v2924_v15 = vsel %vm1612_vm9, %v2922_v33, %v2923_v26  ;;  %v1117_v42 = vsel %vm1045_vm8, %v6224_v0, %v1116_v14 }
  0x69   : > { %v1138_v44 = vshll.u32 %v1028_v34, 16  ;;  %v2927_v25 = vsel %vm1612_vm9, %v2925_v28, %v2926_v29  ;;  %v2853_v30 = vld [vmem:[#allocation2 + $0xc0] sm:$0xfe]  ;;  %v2854_v45 = vld [vmem:[#allocation2 + $0xc8] sm:$0x1]  ;;  %v1150_v47 = vshll.u32 %v1030_v31, 16 }
  0x6a   : > { %v1129_v46 = vsel %vm1045_vm8, %v6232_v6, %v1128_v32  ;;  %v2855_v53 = vld [vmem:[#allocation2 + $0xd0] sm:$0xfe]  ;;  %v2856_v55 = vld [vmem:[#allocation2 + $0xd8] sm:$0x1]  ;;  %v1157_v57 = vshll.u32 %v6213_v56, 16  ;;  %v2928_v0 = vrot.slane %v2853_v30, 1 }
  0x6b   : > { %5213 = vmatmul.mubr.msk.bf16.gmra.mrb[4].mxu1 %vm213_vm1, %v1093_v1  ;;  %v2929_v43 = vrot.slane %v2854_v45, 1  ;;  %v1140_v59 = vrot.slane %v1138_v44, 1  ;;  %v2931_v49 = vrot.slane %v2855_v53, 1  ;;  %v2932_v60 = vrot.slane %v2856_v55, 1  ;;  %v1032_v6 = vld [vmem:[#allocation2 + $0x98] sm:$0x1] }
  0x6c   : > { %5357 = vmatmul.mubr.msk.bf16.gmra.mrb[12].mxu0 %vm213_vm1, %v2918_v10  ;;  %5216 = vmatprep.mubr.msk.bf16.mxu1 %vm213_vm1, %v1105_v22  ;;  %v1152_v61 = vrot.slane %v1150_v47, 1  ;;  %v1169_v37 = vshll.u32 %v6245_v19, 16  ;;  %v1034_v62 = vld [vmem:[#allocation2 + $0xa8] sm:$0x1]  ;;  %v1155_v2 = vshrl.u32 %v6213_v56, 16  ;;  %v1159_v51 = vrot.slane %v1157_v57, 1 }
  0x6d   : > { %5360 = vmatprep.mubr.msk.bf16.mxu0 %vm213_vm1, %v2921_v20  ;;  %v2930_v3 = vsel %vm1612_vm9, %v2928_v0, %v2929_v43  ;;  %v1141_v52 = vsel %vm1045_vm8, %v6260_v36, %v1140_v59  ;;  %v2857_v27 = vld [vmem:[#allocation2 + $0xe0] sm:$0xfe]  ;;  %v2859_v12 = vld [vmem:[#allocation2 + $0xf0] sm:$0xfe]  ;;  %v1162_v16 = vshll.u32 %v1032_v6, 16  ;;  %v1167_v10 = vshrl.u32 %v6245_v19, 16 }
  0x6e   : > { %v2933_v17 = vsel %vm1612_vm9, %v2931_v49, %v2932_v60  ;;  %v2858_v54 = vld [vmem:[#allocation2 + $0xe8] sm:$0x1]  ;;  %v1153_v1 = vsel %vm1045_vm8, %v6283_v63, %v1152_v61  ;;  %v1171_v40 = vrot.slane %v1169_v37, 1  ;;  %v1174_v58 = vshll.u32 %v1034_v62, 16  ;;  %v273_v20 = vld [vmem:[#allocation2 + $0x110] sm:$0x1] }
  0x6f   : > { %v2860_v11 = vld [vmem:[#allocation2 + $0xf8] sm:$0x1]  ;;  %v274_v21 = vsel %vm5990_vm4, 0, %v273_v20  ;;  %v1160_v36 = vor.u32 %v1159_v51, %v1155_v2  ;;  %v1181_v22 = vshll.u32 %v6266_v50, 16  ;;  %v2934_v23 = vrot.slane %v2857_v27, 1  ;;  %v6484_v27 = vld [vmem:[#allocation2 + $0x20] sm:$0xff] }
  0x70   : > { %275 = vst [vmem:[#allocation2 + $0x110] sm:$0x1] %v274_v21  ;;  %v2935_v13 = vrot.slane %v2858_v54, 1  ;;  %v2937_v63 = vrot.slane %v2859_v12, 1  ;;  %v1164_v24 = vrot.slane %v1162_v16, 1  ;;  %v2938_v33 = vrot.slane %v2860_v11, 1 }
  0x71   : > { %v1172_v26 = vor.u32 %v1171_v40, %v1167_v10  ;;  %v1176_v4 = vrot.slane %v1174_v58, 1  ;;  %v1036_v14 = vld [vmem:[#allocation2 + $0xb8] sm:$0x1]  ;;  %v1193_v28 = vshll.u32 %v6291_v18, 16  ;;  %v1038_v29 = vld [vmem:[#allocation2 + $0xc8] sm:$0x1] }
  0x72   : > { %v1179_v32 = vshrl.u32 %v6266_v50, 16  ;;  %v1183_v34 = vrot.slane %v1181_v22, 1  ;;  %v2936_v31 = vsel %vm1612_vm9, %v2934_v23, %v2935_v13  ;;  %v1191_v44 = vshrl.u32 %v6291_v18, 16  ;;  %v2861_v30 = vld [vmem:[#allocation2 + $0x100] sm:$0xfe]  ;;  %v6494_v21 = vld [vmem:[#allocation2 + $0x30] sm:$0xff] }
  0x73   : > { %5217 = vmatmul.mubr.msk.bf16.gmra.mrb[8].mxu1 %vm213_vm1, %v1117_v42  ;;  %v1186_v42 = vshll.u32 %v1036_v14, 16  ;;  %v2862_v45 = vld [vmem:[#allocation2 + $0x108] sm:$0x1]  ;;  %v1195_v47 = vrot.slane %v1193_v28, 1  ;;  %v1198_v53 = vshll.u32 %v1038_v29, 16  ;;  %v2940_v57 = vrot.slane %v2861_v30, 1 }
  0x74   : > { %5361 = vmatmul.mubr.msk.bf16.gmra.mrb[16].mxu0 %vm213_vm1, %v2924_v15  ;;  %5220 = vmatprep.mubr.msk.bf16.mxu1 %vm213_vm1, %v1129_v46  ;;  %v1165_v15 = vsel %vm1045_vm8, %v1160_v36, %v1164_v24  ;;  %v1177_v46 = vsel %vm1045_vm8, %v1172_v26, %v1176_v4  ;;  %v1184_v55 = vor.u32 %v1183_v34, %v1179_v32  ;;  %v2941_v0 = vrot.slane %v2862_v45, 1  ;;  %v1040_v61 = vld [vmem:[#allocation2 + $0xd8] sm:$0x1]  ;;  %v1042_v62 = vld [vmem:[#allocation2 + $0xe8] sm:$0x1]  ;;  %v6500_v24 = vld [vmem:[#allocation2 + $0x40] sm:$0xff] }
  0x75   : > { %5364 = vmatprep.mubr.msk.bf16.mxu0 %vm213_vm1, %v2927_v25  ;;  %v2939_v25 = vsel %vm1612_vm9, %v2937_v63, %v2938_v33  ;;  %v1188_v43 = vrot.slane %v1186_v42, 1  ;;  %v1205_v59 = vshll.u32 %v6310_v35, 16  ;;  %v1196_v49 = vor.u32 %v1195_v47, %v1191_v44  ;;  %v1044_v58 = vld [vmem:[#allocation2 + $0xf8] sm:$0x1]  ;;  %v1548_v26 = vld [vmem:[#allocation2] sm:$0xfe] }
  0x76   : > { %v1200_v60 = vrot.slane %v1198_v53, 1  ;;  %v1217_v6 = vshll.u32 %v6320_v48, 16  ;;  %v1203_v37 = vshrl.u32 %v6310_v35, 16  ;;  %v2942_v2 = vsel %vm1612_vm9, %v2940_v57, %v2941_v0  ;;  %v1549_v4 = vld [vmem:[#allocation2 + $0x8] sm:$0x1]  ;;  %v6519_v42 = vld [vmem:[#allocation2 + $0x60] sm:$0xff] }
  0x77   : > { %v1189_v51 = vsel %vm1045_vm8, %v1184_v55, %v1188_v43  ;;  %v1215_v16 = vshrl.u32 %v6320_v48, 16  ;;  %v1229_v40 = vshll.u32 %v6338_v5, 16  ;;  %v1227_v22 = vshrl.u32 %v6338_v5, 16  ;;  %v6506_v14 = vld [vmem:[%s6920_s1 + $0x10] sm:$0x3] }
  0x78   : > { %v1201_v12 = vsel %vm1045_vm8, %v1196_v49, %v1200_v60  ;;  %v1219_v10 = vrot.slane %v1217_v6, 1  ;;  %v1234_v13 = vshll.u32 %v1044_v58, 16  ;;  %v3887_v63 = vsel %vm784_vm0, %v6394_v41, 0  ;;  %v329_v34 = vld [vmem:[#allocation2 + $0x118] sm:$0x1]  ;;  %v6530_v43 = vld [vmem:[#allocation2 + $0x70] sm:$0xff] }
  0x79   : > { %v1231_v23 = vrot.slane %v1229_v40, 1  ;;  %v1613_v29 = vrot.slane %v1548_v26, 1  ;;  %v1614_v32 = vrot.slane %v1549_v4, 1  ;;  %v1551_v30 = vld [vmem:[#allocation2 + $0x18] sm:$0x1]  ;;  %v330_v45 = vsel %vm6002_vm6, 0, %v329_v34 }
  0x7a   : > { %v1220_v20 = vor.u32 %v1219_v10, %v1215_v16  ;;  %v1236_v28 = vrot.slane %v1234_v13, 1  ;;  %v1553_v47 = vld [vmem:[#allocation2 + $0x28] sm:$0x1]  ;;  %331 = vst [vmem:[#allocation2 + $0x118] sm:$0x1] %v330_v45  ;;  %v1617_v55 = vrot.slane %v1551_v30, 1 }
  0x7b   : > { %5221 = vmatmul.mubr.msk.bf16.gmra.mrb[12].mxu1 %vm213_vm1, %v1141_v52  ;;  %v1210_v52 = vshll.u32 %v1040_v61, 16  ;;  %v1232_v41 = vor.u32 %v1231_v23, %v1227_v22  ;;  %v1615_v44 = vsel %vm1612_vm9, %v1613_v29, %v1614_v32  ;;  %v1620_v0 = vrot.slane %v1553_v47, 1  ;;  %v1554_v49 = vld [vmem:[#allocation2 + $0x30] sm:$0xfe]  ;;  %v1555_v60 = vld [vmem:[#allocation2 + $0x38] sm:$0x1] }
  0x7c   : > { %5365 = vmatmul.mubr.msk.bf16.gmra.mrb[20].mxu0 %vm213_vm1, %v2930_v3  ;;  %5224 = vmatprep.mubr.msk.bf16.mxu1 %vm213_vm1, %v1153_v1  ;;  %v1207_v3 = vrot.slane %v1205_v59, 1  ;;  %v2070_v61 = vsel %vm784_vm0, %v6437_v38, 0  ;;  %v1556_v6 = vld [vmem:[#allocation2 + $0x40] sm:$0xfe]  ;;  %v5809_v38 = vld [vmem:[%s6920_s1 + $0x8] sm:$0x3] }
  0x7d   : > { %5368 = vmatprep.mubr.msk.bf16.mxu0 %vm213_vm1, %v2933_v17  ;;  %v1222_v17 = vshll.u32 %v1042_v62, 16  ;;  %v1212_v1 = vrot.slane %v1210_v52, 1  ;;  %v1622_v62 = vrot.slane %v1554_v49, 1  ;;  %v1558_v16 = vld [vmem:[#allocation2 + $0x50] sm:$0xfe] }
  0x7e   : > { %v1208_v54 = vor.u32 %v1207_v3, %v1203_v37  ;;  %v1557_v37 = vld [vmem:[#allocation2 + $0x48] sm:$0x1]  ;;  %v1559_v10 = vld [vmem:[#allocation2 + $0x58] sm:$0x1]  ;;  %v1564_v23 = vld [vmem:[#allocation2 + $0x80] sm:$0xfe] }
  0x7f   : > { %v1224_v11 = vrot.slane %v1222_v17, 1  ;;  %v1626_v3 = vrot.slane %v1557_v37, 1  ;;  %v1561_v17 = vld [vmem:[#allocation2 + $0x68] sm:$0x1]  ;;  %v1563_v22 = vld [vmem:[#allocation2 + $0x78] sm:$0x1] }
  0x80   : > { %v1213_v36 = vsel %vm1045_vm8, %v1208_v54, %v1212_v1  ;;  %v1628_v54 = vrot.slane %v1558_v16, 1  ;;  %v1629_v1 = vrot.slane %v1559_v10, 1  ;;  %v1632_v58 = vrot.slane %v1561_v17, 1  ;;  %v1565_v13 = vld [vmem:[#allocation2 + $0x88] sm:$0x1] }
  0x81   : > { %v1225_v33 = vsel %vm1045_vm8, %v1220_v20, %v1224_v11  ;;  %v1568_v29 = vld [vmem:[#allocation2 + $0xa0] sm:$0xfe]  ;;  %v1569_v32 = vld [vmem:[#allocation2 + $0xa8] sm:$0x1]  ;;  %v3583_v49 = vld [vmem:[#allocation2 + $0x38] sm:$0x1] }
  0x82   : > { %v1630_v20 = vsel %vm1612_vm9, %v1628_v54, %v1629_v1  ;;  %v1643_v34 = vrot.slane %v1568_v29, 1  ;;  %v1574_v54 = vld [vmem:[#allocation2 + $0xd0] sm:$0xfe]  ;;  %v1575_v1 = vld [vmem:[#allocation2 + $0xd8] sm:$0x1] }
  0x83   : > { %5225 = vmatmul.mubr.msk.bf16.gmra.mrb[16].mxu1 %vm213_vm1, %v1165_v15  ;;  %v1237_v15 = vsel %vm1045_vm8, %v1232_v41, %v1236_v28  ;;  %v1566_v41 = vld [vmem:[#allocation2 + $0x90] sm:$0xfe]  ;;  %v1567_v28 = vld [vmem:[#allocation2 + $0x98] sm:$0x1] }
  0x84   : > { %5369 = vmatmul.mubr.msk.bf16.gmra.mrb[24].mxu0 %vm213_vm1, %v2936_v31  ;;  %5228 = vmatprep.mubr.msk.bf16.mxu1 %vm213_vm1, %v1177_v46  ;;  %v6516_v31 = vld [vmem:[#allocation2 + $0x50] sm:$0xff]  ;;  %v1552_v46 = vld [vmem:[#allocation2 + $0x20] sm:$0xfe] }
  0x85   : > { %5372 = vmatprep.mubr.msk.bf16.mxu0 %vm213_vm1, %v2939_v25  ;;  %v1550_v25 = vld [vmem:[#allocation2 + $0x10] sm:$0xfe]  ;;  %v1619_v57 = vrot.slane %v1552_v46, 1 }
  0x86   : > { %v1616_v53 = vrot.slane %v1550_v25, 1  ;;  %v3615_v25 = vshll.u32 %v6484_v27, 16 }
  0x87   : > { %v1621_v59 = vsel %vm1612_vm9, %v1619_v57, %v1620_v0  ;;  %v1573_v57 = vld [vmem:[#allocation2 + $0xc8] sm:$0x1] }
  0x88   : > { %v1618_v8 = vsel %vm1612_vm9, %v1616_v53, %v1617_v55  ;;  %v3617_v47 = vrot.slane %v3615_v25, 1  ;;  %v1570_v53 = vld [vmem:[#allocation2 + $0xb0] sm:$0xfe]  ;;  %v1571_v55 = vld [vmem:[#allocation2 + $0xb8] sm:$0x1]  ;;  %v1650_v37 = vrot.slane %v1573_v57, 1 }
  0x8b   : > { %5229 = vmatmul.mubr.msk.bf16.gmra.mrb[20].mxu1 %vm213_vm1, %v1189_v51  ;;  %v1625_v51 = vrot.slane %v1556_v6, 1 }
  0x8c   : > { %5373 = vmatmul.mubr.msk.bf16.gmra.mrb[28].mxu0 %vm213_vm1, %v2942_v2  ;;  %5232 = vmatprep.mubr.msk.bf16.mxu1 %vm213_vm1, %v1201_v12  ;;  %v1623_v2 = vrot.slane %v1555_v60, 1  ;;  %v3627_v60 = vshll.u32 %v6494_v21, 16 }
  0x8d   : > { %5378 = vmatprep.mubr.msk.bf16.mxu0 %vm213_vm1, %v6484_v27  ;;  %v1627_v12 = vsel %vm1612_vm9, %v1625_v51, %v1626_v3  ;;  %v6582_v51 = vld [vmem:[#allocation2 + $0x110] sm:$0xff] }
  0x8e   : > { %v1624_v52 = vsel %vm1612_vm9, %v1622_v62, %v1623_v2  ;;  %v3639_v62 = vshll.u32 %v6500_v24, 16  ;;  %v3585_v2 = vld [vmem:[#allocation2 + $0x48] sm:$0x1] }
  0x8f   : > { %v3644_v17 = vshll.u32 %v3585_v2, 16 }
  0x93   : > { %5233 = vmatmul.mubr.msk.bf16.gmra.mrb[24].mxu1 %vm213_vm1, %v1213_v36  ;;  %v1562_v36 = vld [vmem:[#allocation2 + $0x70] sm:$0xfe] }
  0x94   : > { %5379 = vmatmul.mubr.msk.bf16.vlgmr.msra.gmra.mrb[0].mxu0 %vm213_vm1, %v6494_v21  ;;  %5236 = vmatprep.mubr.msk.bf16.mxu1 %vm213_vm1, %v1225_v33  ;;  %v1638_v33 = vrot.slane %v1565_v13, 1  ;;  %v3651_v13 = vshll.u32 %v6516_v31, 16 }
  0x95   : > { %5411 = vmatpush3.bf16.msra.mxu0 %v3887_v63  ;;  %5382 = vmatprep.mubr.msk.bf16.mxu0 %vm213_vm1, %v6500_v24  ;;  %v1637_v63 = vrot.slane %v1564_v23, 1  ;;  %v3587_v23 = vld [vmem:[#allocation2 + $0x58] sm:$0x1] }
  0x96   : > { %5745 = vmatprep.subr.msk.bf16.mxu0 %vm784_vm0, %v6506_v14 }
  0x97   : > { %v1639_v4 = vsel %vm1612_vm9, %v1637_v63, %v1638_v33  ;;  %v3663_v63 = vshll.u32 %v6519_v42, 16 }
  0x99   : > { %v3665_v25 = vrot.slane %v3663_v63, 1 }
  0x9b   : > { %5237 = vmatmul.mubr.msk.bf16.gmra.mrb[28].mxu1 %vm213_vm1, %v1237_v15  ;;  %v1644_v15 = vrot.slane %v1569_v32, 1 }
  0x9c   : > { %5383 = vmatmul.mubr.msk.bf16.gmra.mrb[4].mxu0 %vm213_vm1, %v6516_v31  ;;  %5242 = vmatprep.mubr.msk.bf16.mxu1 %vm213_vm1, %v1615_v44  ;;  %v3581_v44 = vld [vmem:[#allocation2 + $0x28] sm:$0x1] }
  0x9d   : > { %5386 = vmatprep.mubr.msk.bf16.mxu0 %vm213_vm1, %v6519_v42  ;;  %v3620_v45 = vshll.u32 %v3581_v44, 16  ;;  %v1645_v46 = vsel %vm1612_vm9, %v1643_v34, %v1644_v15  ;;  %v1578_v34 = vld [vmem:[#allocation2 + $0xf0] sm:$0xfe]  ;;  %v3661_v44 = vshrl.u32 %v6519_v42, 16 }
  0x9f   : > { %v3622_v0 = vrot.slane %v3620_v45, 1  ;;  %v1579_v45 = vld [vmem:[#allocation2 + $0xf8] sm:$0x1]  ;;  %v3666_v57 = vor.u32 %v3665_v25, %v3661_v44 }
  0xa3   : > { %5243 = vmatmul.mubr.msk.bf16.vlgmr.msra.gmra.mrb[0].mxu1 %vm213_vm1, %v1618_v8  ;;  %v1646_v8 = vrot.slane %v1570_v53, 1  ;;  %v1658_v53 = vrot.slane %v1578_v34, 1  ;;  %v3601_v34 = vld [vmem:[#allocation2 + $0xc8] sm:$0x1] }
  0xa4   : > { %5387 = vmatmul.mubr.msk.bf16.gmra.mrb[8].mxu0 %vm213_vm1, %v6530_v43  ;;  %5246 = vmatprep.mubr.msk.bf16.mxu1 %vm213_vm1, %v1621_v59  ;;  %v1647_v59 = vrot.slane %v1571_v55, 1  ;;  %v1659_v55 = vrot.slane %v1579_v45, 1 }
  0xa5   : > { %5390 = vmatprep.mubr.msk.bf16.mxu0 %vm213_vm1, %v6193_v39  ;;  %5275 = vmatpush3.bf16.msra.mxu1 %v2070_v61  ;;  %v1560_v39 = vld [vmem:[#allocation2 + $0x60] sm:$0xfe] }
  0xa6   : > { %5741 = vmatprep.subr.msk.bf16.mxu1 %vm784_vm0, %v5809_v38  ;;  %v1631_v40 = vrot.slane %v1560_v39, 1  ;;  %v1648_v3 = vsel %vm1612_vm9, %v1646_v8, %v1647_v59  ;;  %v3625_v38 = vshrl.u32 %v6494_v21, 16  ;;  %v3641_v39 = vrot.slane %v3639_v62, 1  ;;  %v3591_v8 = vld [vmem:[#allocation2 + $0x78] sm:$0x1] }
  0xa7   : > { %v3680_v62 = vshll.u32 %v3591_v8, 16 }
  0xa8   : > { %v1633_v11 = vsel %vm1612_vm9, %v1631_v40, %v1632_v58  ;;  %v1576_v58 = vld [vmem:[#allocation2 + $0xe0] sm:$0xfe] }
  0xa9   : > { %v1655_v33 = vrot.slane %v1576_v58, 1 }
  0xab   : > { %5247 = vmatmul.mubr.msk.bf16.gmra.mrb[4].mxu1 %vm213_vm1, %v1624_v52  ;;  %v3629_v52 = vrot.slane %v3627_v60, 1  ;;  %v3673_v60 = vshrl.u32 %v6530_v43, 16 }
  0xac   : > { %5391 = vmatmul.mubr.msk.bf16.gmra.mrb[12].mxu0 %vm213_vm1, %v6213_v56  ;;  %5250 = vmatprep.mubr.msk.bf16.mxu1 %vm213_vm1, %v1627_v12  ;;  %v1634_v56 = vrot.slane %v1562_v36, 1  ;;  %v3637_v12 = vshrl.u32 %v6500_v24, 16  ;;  %v1652_v36 = vrot.slane %v1574_v54, 1 }
  0xad   : > { %5394 = vmatprep.mubr.msk.bf16.mxu0 %vm213_vm1, %v6245_v19  ;;  %v1635_v19 = vrot.slane %v1563_v22, 1  ;;  %v1653_v22 = vrot.slane %v1575_v1, 1 }
  0xaf   : > { %v1636_v26 = vsel %vm1612_vm9, %v1634_v56, %v1635_v19  ;;  %v3642_v56 = vor.u32 %v3641_v39, %v3637_v12  ;;  %v3646_v19 = vrot.slane %v3644_v17, 1  ;;  %v1654_v32 = vsel %vm1612_vm9, %v1652_v36, %v1653_v22  ;;  %v6617_v12 = vld [vmem:[#allocation2 + $0x90] sm:$0xff] }
  0xb0   : > { %v3682_v39 = vrot.slane %v3680_v62, 1  ;;  %v3699_v17 = vshll.u32 %v6617_v12, 16  ;;  %v3697_v36 = vshrl.u32 %v6617_v12, 16 }
  0xb1   : > { %v3647_v15 = vsel %vm1045_vm8, %v3642_v56, %v3646_v19 }
  0xb2   : > { %v3701_v22 = vrot.slane %v3699_v17, 1  ;;  %v3783_v17 = vshll.u32 %v6422_v7, 16 }
  0xb3   : > { %5251 = vmatmul.mubr.msk.bf16.gmra.mrb[8].mxu1 %vm213_vm1, %v1630_v20  ;;  %v1577_v20 = vld [vmem:[#allocation2 + $0xe8] sm:$0x1] }
  0xb4   : > { %5395 = vmatmul.mubr.msk.bf16.gmra.mrb[16].mxu0 %vm213_vm1, %v6266_v50  ;;  %5254 = vmatprep.mubr.msk.bf16.mxu1 %vm213_vm1, %v1633_v11  ;;  %v1640_v50 = vrot.slane %v1566_v41, 1  ;;  %v3630_v11 = vor.u32 %v3629_v52, %v3625_v38  ;;  %v4309_v41 = vsel %vm784_vm0, %v6506_v14, 0 }
  0xb5   : > { %5398 = vmatprep.mubr.msk.bf16.mxu0 %vm213_vm1, %v6291_v18  ;;  %v1641_v18 = vrot.slane %v1567_v28, 1  ;;  %v3656_v28 = vshll.u32 %v3587_v23, 16 }
  0xb7   : > { %v1642_v30 = vsel %vm1612_vm9, %v1640_v50, %v1641_v18  ;;  %v3649_v50 = vshrl.u32 %v6516_v31, 16  ;;  %v3653_v18 = vrot.slane %v3651_v13, 1  ;;  %v3658_v14 = vrot.slane %v3656_v28, 1 }
  0xbb   : > { %5255 = vmatmul.mubr.msk.bf16.gmra.mrb[12].mxu1 %vm213_vm1, %v1636_v26  ;;  %v1656_v26 = vrot.slane %v1577_v20, 1  ;;  %v3597_v20 = vld [vmem:[#allocation2 + $0xa8] sm:$0x1] }
  0xbc   : > { %5399 = vmatmul.mubr.msk.bf16.gmra.mrb[20].mxu0 %vm213_vm1, %v6310_v35  ;;  %5258 = vmatprep.mubr.msk.bf16.mxu1 %vm213_vm1, %v1639_v4  ;;  %v3613_v35 = vshrl.u32 %v6484_v27, 16  ;;  %v3589_v4 = vld [vmem:[#allocation2 + $0x68] sm:$0x1]  ;;  %v3716_v63 = vshll.u32 %v3597_v20, 16 }
  0xbd   : > { %5402 = vmatprep.mubr.msk.bf16.mxu0 %vm213_vm1, %v6320_v48  ;;  %v1572_v48 = vld [vmem:[#allocation2 + $0xc0] sm:$0xfe] }
  0xbe   : > { %v3618_v61 = vor.u32 %v3617_v47, %v3613_v35  ;;  %v1649_v6 = vrot.slane %v1572_v48, 1  ;;  %v6604_v35 = vld [vmem:[#allocation2 + $0x80] sm:$0xff]  ;;  %v3654_v47 = vor.u32 %v3653_v18, %v3649_v50  ;;  %v3675_v48 = vshll.u32 %v6530_v43, 16  ;;  %v3599_v50 = vld [vmem:[#allocation2 + $0xb8] sm:$0x1] }
  0xbf   : > { %v3687_v59 = vshll.u32 %v6604_v35, 16  ;;  %v3728_v25 = vshll.u32 %v3599_v50, 16 }
  0xc0   : > { %v3623_v16 = vsel %vm1045_vm8, %v3618_v61, %v3622_v0  ;;  %v1651_v10 = vsel %vm1612_vm9, %v1649_v6, %v1650_v37  ;;  %v3659_v61 = vsel %vm1045_vm8, %v3654_v47, %v3658_v14  ;;  %v1660_v6 = vsel %vm1612_vm9, %v1658_v53, %v1659_v55  ;;  %v6654_v14 = vld [vmem:[#allocation2 + $0xd0] sm:$0xff] }
  0xc1   : > { %v3677_v37 = vrot.slane %v3675_v48, 1  ;;  %v3689_v38 = vrot.slane %v3687_v59, 1  ;;  %v3730_v53 = vrot.slane %v3728_v25, 1  ;;  %v3747_v55 = vshll.u32 %v6654_v14, 16  ;;  %v3605_v59 = vld [vmem:[#allocation2 + $0xe8] sm:$0x1] }
  0xc2   : > { %v3764_v62 = vshll.u32 %v3605_v59, 16  ;;  %v4120_v59 = vld [vmem:[#allocation2 + $0x50] sm:$0xfe] }
  0xc3   : > { %5259 = vmatmul.mubr.msk.bf16.gmra.mrb[16].mxu1 %vm213_vm1, %v1642_v30  ;;  %v3668_v30 = vshll.u32 %v3589_v4, 16  ;;  %v6639_v4 = vor.u32 %v3701_v22, %v3697_v36 }
  0xc4   : > { %5403 = vmatmul.mubr.msk.bf16.gmra.mrb[24].mxu0 %vm213_vm1, %v6338_v5  ;;  %5262 = vmatprep.mubr.msk.bf16.mxu1 %vm213_vm1, %v1645_v46  ;;  %v3632_v5 = vshll.u32 %v3583_v49, 16  ;;  %v1657_v46 = vsel %vm1612_vm9, %v1655_v33, %v1656_v26  ;;  %v3593_v49 = vld [vmem:[#allocation2 + $0x88] sm:$0x1]  ;;  %v6631_v33 = vld [vmem:[#allocation2 + $0xb0] sm:$0xff]  ;;  %v6633_v26 = vld [vmem:[#allocation2 + $0xc0] sm:$0xff] }
  0xc5   : > { %5406 = vmatprep.mubr.msk.bf16.mxu0 %vm213_vm1, %v6422_v7  ;;  %v3670_v0 = vrot.slane %v3668_v30, 1  ;;  %v3692_v52 = vshll.u32 %v3593_v49, 16  ;;  %v3723_v28 = vshll.u32 %v6631_v33, 16  ;;  %v3735_v18 = vshll.u32 %v6633_v26, 16 }
  0xc6   : > { %v3634_v40 = vrot.slane %v3632_v5, 1  ;;  %v1971_v5 = vld [vmem:[#allocation2 + $0x10] sm:$0xff]  ;;  %v3733_v30 = vshrl.u32 %v6633_v26, 16  ;;  %v3745_v49 = vshrl.u32 %v6654_v14, 16 }
  0xc7   : > { %v3671_v2 = vsel %vm1045_vm8, %v3666_v57, %v3670_v0  ;;  %v3694_v1 = vrot.slane %v3692_v52, 1  ;;  %v3725_v44 = vrot.slane %v3723_v28, 1  ;;  %v3737_v45 = vrot.slane %v3735_v18, 1  ;;  %v3603_v0 = vld [vmem:[#allocation2 + $0xd8] sm:$0x1] }
  0xc8   : > { %v3635_v29 = vsel %vm1045_vm8, %v3630_v11, %v3634_v40  ;;  %v3595_v40 = vld [vmem:[#allocation2 + $0x98] sm:$0x1]  ;;  %v3793_v28 = vshrl.u32 %v6582_v51, 16  ;;  %v4114_v18 = vld [vmem:[#allocation2 + $0x20] sm:$0xfe] }
  0xc9   : > { %v3704_v23 = vshll.u32 %v3595_v40, 16  ;;  %v6667_v48 = vor.u32 %v3737_v45, %v3733_v30  ;;  %v4117_v30 = vld [vmem:[#allocation2 + $0x38] sm:$0x1]  ;;  %v4118_v45 = vld [vmem:[#allocation2 + $0x40] sm:$0xfe] }
  0xcb   : > { %5263 = vmatmul.mubr.msk.bf16.gmra.mrb[20].mxu1 %vm213_vm1, %v1648_v3  ;;  %v3685_v3 = vshrl.u32 %v6604_v35, 16 }
  0xcc   : > { %5407 = vmatmul.mubr.msk.bf16.gmra.mrb[28].mxu0 %vm213_vm1, %v6582_v51  ;;  %5266 = vmatprep.mubr.msk.bf16.mxu1 %vm213_vm1, %v1651_v10  ;;  %v3678_v10 = vor.u32 %v3677_v37, %v3673_v60  ;;  %v3749_v60 = vrot.slane %v3747_v55, 1 }
  0xcd   : > { %5412 = vmatprep.mubr.msk.bf16.mxu0 %vm213_vm1, %v3623_v16  ;;  %v6619_v16 = vld [vmem:[#allocation2 + $0xa0] sm:$0xff]  ;;  %v3690_v54 = vor.u32 %v3689_v38, %v3685_v3 }
  0xce   : > { %v3711_v58 = vshll.u32 %v6619_v16, 16  ;;  %v3683_v11 = vsel %vm1045_vm8, %v3678_v10, %v3682_v39  ;;  %v3709_v56 = vshrl.u32 %v6619_v16, 16  ;;  %v3766_v10 = vrot.slane %v3764_v62, 1  ;;  %v3607_v39 = vld [vmem:[#allocation2 + $0xf8] sm:$0x1] }
  0xcf   : > { %v3695_v13 = vsel %vm1045_vm8, %v3690_v54, %v3694_v1  ;;  %v3609_v54 = vld [vmem:[#allocation2 + $0x108] sm:$0x1] }
  0xd0   : > { %v3713_v19 = vrot.slane %v3711_v58, 1  ;;  %v3776_v58 = vshll.u32 %v3607_v39, 16  ;;  %v3788_v36 = vshll.u32 %v3609_v54, 16  ;;  %v2316_v62 = vld [vmem:[#allocation2 + $0xa8] sm:$0x1] }
  0xd1   : > { %v4125_v54 = vld [vmem:[#allocation2 + $0x78] sm:$0x1] }
  0xd3   : > { %5267 = vmatmul.mubr.msk.bf16.gmra.mrb[24].mxu1 %vm213_vm1, %v1654_v32  ;;  %v3718_v32 = vrot.slane %v3716_v63, 1  ;;  %v3611_v63 = vld [vmem:[#allocation2 + $0x118] sm:$0x1] }
  0xd4   : > { %5413 = vmatmul.mubr.msk.bf16.vlgmr.msra.gmra.mrb[0].mxu0 %vm213_vm1, %v3635_v29  ;;  %5270 = vmatprep.mubr.msk.bf16.mxu1 %vm213_vm1, %v1657_v46  ;;  %v6644_v29 = vor.u32 %v3713_v19, %v3709_v56  ;;  %v3740_v46 = vshll.u32 %v3601_v34, 16  ;;  %v3790_v19 = vrot.slane %v3788_v36, 1  ;;  %v4115_v34 = vld [vmem:[#allocation2 + $0x28] sm:$0x1] }
  0xd5   : > { %5445 = vmatpush3.bf16.msra.mxu0 %v4309_v41  ;;  %5416 = vmatprep.mubr.msk.bf16.mxu0 %vm213_vm1, %v3647_v15  ;;  %v3706_v41 = vrot.slane %v3704_v23, 1  ;;  %v3721_v15 = vshrl.u32 %v6631_v33, 16  ;;  %v3778_v23 = vrot.slane %v3776_v58, 1  ;;  %v4194_v58 = vrot.slane %v4125_v54, 1 }
  0xd6   : > { %v3742_v57 = vrot.slane %v3740_v46, 1  ;;  %v4119_v46 = vld [vmem:[#allocation2 + $0x48] sm:$0x1] }
  0xd7   : > { %v6662_v47 = vor.u32 %v3725_v44, %v3721_v15  ;;  %v4178_v15 = vrot.slane %v4114_v18, 1  ;;  %v4185_v55 = vrot.slane %v4119_v46, 1 }
  0xdb   : > { %5271 = vmatmul.mubr.msk.bf16.gmra.mrb[28].mxu1 %vm213_vm1, %v1660_v6  ;;  %v3743_v6 = vsel %vm1045_vm8, %v6667_v48, %v3742_v57  ;;  %v2314_v57 = vld [vmem:[#allocation2 + $0x98] sm:$0x1] }
  0xdc   : > { %5417 = vmatmul.mubr.msk.bf16.gmra.mrb[4].mxu0 %vm213_vm1, %v3659_v61  ;;  %5276 = vmatprep.mubr.msk.bf16.mxu1 %vm213_vm1, %v1971_v5  ;;  %v3752_v61 = vshll.u32 %v3603_v0, 16  ;;  %v6682_v5 = vor.u32 %v3749_v60, %v3745_v49  ;;  %v2433_v49 = vshll.u32 %v2314_v57, 16  ;;  %v4122_v60 = vld [vmem:[#allocation2 + $0x60] sm:$0xfe]  ;;  %v4135_v57 = vld [vmem:[#allocation2 + $0xc8] sm:$0x1] }
  0xdd   : > { %5420 = vmatprep.mubr.msk.bf16.mxu0 %vm213_vm1, %v3671_v2  ;;  %v6676_v2 = vld [vmem:[#allocation2 + $0xf0] sm:$0xff] }
  0xde   : > { %v3754_v3 = vrot.slane %v3752_v61, 1  ;;  %v3771_v38 = vshll.u32 %v6676_v2, 16  ;;  %v3769_v1 = vshrl.u32 %v6676_v2, 16  ;;  %v4123_v61 = vld [vmem:[#allocation2 + $0x68] sm:$0x1] }
  0xe0   : > { %v3773_v40 = vrot.slane %v3771_v38, 1 }
  0xe2   : > { %v6700_v22 = vor.u32 %v3773_v40, %v3769_v1  ;;  %v4126_v1 = vld [vmem:[#allocation2 + $0x80] sm:$0xfe]  ;;  %v4127_v40 = vld [vmem:[#allocation2 + $0x88] sm:$0x1] }
  0xe3   : > { %5277 = vmatmul.mubr.msk.bf16.vlgmr.msra.gmra.mrb[0].mxu1 %vm213_vm1, %v6484_v27  ;;  %v3707_v27 = vsel %vm1045_vm8, %v6639_v4, %v3706_v41 }
  0xe4   : > { %5421 = vmatmul.mubr.msk.bf16.gmra.mrb[8].mxu0 %vm213_vm1, %v3683_v11  ;;  %5280 = vmatprep.mubr.msk.bf16.mxu1 %vm213_vm1, %v6494_v21  ;;  %v3719_v21 = vsel %vm1045_vm8, %v6644_v29, %v3718_v32  ;;  %v3785_v11 = vrot.slane %v3783_v17, 1  ;;  %v3779_v41 = vsel %vm1045_vm8, %v6700_v22, %v3778_v23  ;;  %v4124_v17 = vld [vmem:[#allocation2 + $0x70] sm:$0xfe]  ;;  %v2320_v23 = vld [vmem:[#allocation2 + $0xc8] sm:$0x1] }
  0xe5   : > { %5424 = vmatprep.mubr.msk.bf16.mxu0 %vm213_vm1, %v3695_v13  ;;  %5479 = vmatpush3.bf16.msra.mxu1 %v6008_v9  ;;  %v6656_v9 = vld [vmem:[#allocation2 + $0xe0] sm:$0xff]  ;;  %v3795_v13 = vshll.u32 %v6582_v51, 16  ;;  %v4179_v51 = vrot.slane %v4115_v34, 1 }
  0xe6   : > { %v3759_v8 = vshll.u32 %v6656_v9, 16 }
  0xe7   : > { %v3797_v32 = vrot.slane %v3795_v13, 1  ;;  %v4180_v25 = vsel %vm1612_vm9, %v4178_v15, %v4179_v51  ;;  %v2324_v51 = vld [vmem:[#allocation2 + $0xe8] sm:$0x1] }
  0xe8   : > { %v3761_v37 = vrot.slane %v3759_v8, 1 }
  0xeb   : > { %5281 = vmatmul.mubr.msk.bf16.gmra.mrb[4].mxu1 %vm213_vm1, %v6500_v24  ;;  %v3731_v24 = vsel %vm1045_vm8, %v6662_v47, %v3730_v53  ;;  %v4182_v53 = vrot.slane %v4117_v30, 1  ;;  %v4133_v30 = vld [vmem:[#allocation2 + $0xb8] sm:$0x1] }
  0xec   : > { %5425 = vmatmul.mubr.msk.bf16.gmra.mrb[12].mxu0 %vm213_vm1, %v3707_v27  ;;  %5284 = vmatprep.mubr.msk.bf16.mxu1 %vm213_vm1, %v6516_v31  ;;  %v3757_v31 = vshrl.u32 %v6656_v9, 16 }
  0xed   : > { %5428 = vmatprep.mubr.msk.bf16.mxu0 %vm213_vm1, %v3719_v21  ;;  %v4116_v21 = vld [vmem:[#allocation2 + $0x30] sm:$0xfe] }
  0xee   : > { %v6687_v52 = vor.u32 %v3761_v37, %v3757_v31  ;;  %v4191_v31 = vrot.slane %v4123_v61, 1  ;;  %v2435_v37 = vrot.slane %v2433_v49, 1  ;;  %v4209_v49 = vrot.slane %v4135_v57, 1 }
  0xf0   : > { %v3767_v20 = vsel %vm1045_vm8, %v6687_v52, %v3766_v10  ;;  %v2445_v10 = vshll.u32 %v2316_v62, 16  ;;  %v4136_v62 = vld [vmem:[#allocation2 + $0xd0] sm:$0xfe] }
  0xf3   : > { %5285 = vmatmul.mubr.msk.bf16.gmra.mrb[8].mxu1 %vm213_vm1, %v6519_v42  ;;  %v3755_v42 = vsel %vm1045_vm8, %v6682_v5, %v3754_v3  ;;  %v2318_v3 = vld [vmem:[#allocation2 + $0xb8] sm:$0x1] }
  0xf4   : > { %5429 = vmatmul.mubr.msk.bf16.gmra.mrb[16].mxu0 %vm213_vm1, %v3731_v24  ;;  %5288 = vmatprep.mubr.msk.bf16.mxu1 %vm213_vm1, %v6530_v43  ;;  %v3781_v43 = vshrl.u32 %v6422_v7, 16  ;;  %v4121_v24 = vld [vmem:[#allocation2 + $0x58] sm:$0x1] }
  0xf5   : > { %5432 = vmatprep.mubr.msk.bf16.mxu0 %vm213_vm1, %v3743_v6  ;;  %v4190_v6 = vrot.slane %v4122_v60, 1 }
  0xf6   : > { %v3786_v56 = vor.u32 %v3785_v11, %v3781_v43  ;;  %v4196_v43 = vrot.slane %v4126_v1, 1  ;;  %v4197_v11 = vrot.slane %v4127_v40, 1 }
  0xf7   : > { %v4192_v39 = vsel %vm1612_vm9, %v4190_v6, %v4191_v31 }
  0xf8   : > { %v3791_v50 = vsel %vm1045_vm8, %v3786_v56, %v3790_v19  ;;  %v2469_v19 = vshll.u32 %v2320_v23, 16 }
  0xfb   : > { %5289 = vmatmul.mubr.msk.bf16.gmra.mrb[12].mxu1 %vm213_vm1, %v6604_v35  ;;  %v3800_v35 = vshll.u32 %v3611_v63, 16  ;;  %v4128_v63 = vld [vmem:[#allocation2 + $0x90] sm:$0xfe] }
  0xfc   : > { %5433 = vmatmul.mubr.msk.bf16.gmra.mrb[20].mxu0 %vm213_vm1, %v3755_v42  ;;  %5292 = vmatprep.mubr.msk.bf16.mxu1 %vm213_vm1, %v6617_v12  ;;  %v3798_v12 = vor.u32 %v3797_v32, %v3793_v28  ;;  %v2457_v42 = vshll.u32 %v2318_v3, 16  ;;  %v4199_v18 = vrot.slane %v4128_v63, 1  ;;  %v4137_v3 = vld [vmem:[#allocation2 + $0xd8] sm:$0x1] }
  0xfd   : > { %5436 = vmatprep.mubr.msk.bf16.mxu0 %vm213_vm1, %v3767_v20  ;;  %v3802_v27 = vrot.slane %v3800_v35, 1  ;;  %v2447_v20 = vrot.slane %v2445_v10, 1  ;;  %v4130_v35 = vld [vmem:[#allocation2 + $0xa0] sm:$0xfe]  ;;  %v4145_v63 = vld [vmem:[#allocation2 + $0x118] sm:$0x1] }
  0xfe   : > { %v2459_v36 = vrot.slane %v2457_v42, 1  ;;  %v4138_v10 = vld [vmem:[#allocation2 + $0xe0] sm:$0xfe] }
  0xff   : > { %v3803_v44 = vsel %vm1045_vm8, %v3798_v12, %v3802_v27  ;;  %v2448_v56 = vsel %vm1045_vm8, %v6644_v29, %v2447_v20  ;;  %v2471_v29 = vrot.slane %v2469_v19, 1  ;;  %v4202_v12 = vrot.slane %v4130_v35, 1  ;;  %v4141_v20 = vld [vmem:[#allocation2 + $0xf8] sm:$0x1] }
 0x100   : > { %v2460_v28 = vsel %vm1045_vm8, %v6662_v47, %v2459_v36  ;;  %v4214_v42 = vrot.slane %v4138_v10, 1  ;;  %v4218_v23 = vrot.slane %v4141_v20, 1 }
 0x103   : > { %5293 = vmatmul.mubr.msk.bf16.gmra.mrb[16].mxu1 %vm213_vm1, %v6619_v16  ;;  %v4181_v16 = vrot.slane %v4116_v21, 1  ;;  %v4132_v21 = vld [vmem:[#allocation2 + $0xb0] sm:$0xfe] }
 0x104   : > { %5437 = vmatmul.mubr.msk.bf16.gmra.mrb[24].mxu0 %vm213_vm1, %v3779_v41  ;;  %5296 = vmatprep.mubr.msk.bf16.mxu1 %vm213_vm1, %v6631_v33  ;;  %v4184_v33 = vrot.slane %v4118_v45, 1  ;;  %v4129_v41 = vld [vmem:[#allocation2 + $0x98] sm:$0x1]  ;;  %v2493_v45 = vshll.u32 %v2324_v51, 16 }
 0x105   : > { %5440 = vmatprep.mubr.msk.bf16.mxu0 %vm213_vm1, %v3791_v50  ;;  %v4183_v0 = vsel %vm1612_vm9, %v4181_v16, %v4182_v53  ;;  %v4131_v50 = vld [vmem:[#allocation2 + $0xa8] sm:$0x1]  ;;  %v4200_v34 = vrot.slane %v4129_v41, 1 }
 0x106   : > { %v4186_v8 = vsel %vm1612_vm9, %v4184_v33, %v4185_v55  ;;  %v4203_v27 = vrot.slane %v4131_v50, 1  ;;  %v2327_v33 = vld [vmem:[#allocation2 + $0x100] sm:$0xff] }
 0x107   : > { %v4201_v47 = vsel %vm1612_vm9, %v4199_v18, %v4200_v34  ;;  %v4134_v55 = vld [vmem:[#allocation2 + $0xc0] sm:$0xfe] }
 0x108   : > { %v4204_v46 = vsel %vm1612_vm9, %v4202_v12, %v4203_v27 }
 0x10b   : > { %5297 = vmatmul.mubr.msk.bf16.gmra.mrb[20].mxu1 %vm213_vm1, %v6633_v26  ;;  %v4187_v26 = vrot.slane %v4120_v59, 1  ;;  %v2512_v59 = vshll.u32 %v2327_v33, 16 }
 0x10c   : > { %5441 = vmatmul.mubr.msk.bf16.gmra.mrb[28].mxu0 %vm213_vm1, %v3803_v44  ;;  %5300 = vmatprep.mubr.msk.bf16.mxu1 %vm213_vm1, %v6654_v14  ;;  %v4188_v14 = vrot.slane %v4121_v24, 1  ;;  %v2326_v44 = vld [vmem:[#allocation2 + $0xf8] sm:$0x1]  ;;  %v4208_v24 = vrot.slane %v4134_v55, 1 }
 0x10d   : > { %5446 = vmatprep.mubr.msk.bf16.mxu0 %vm213_vm1, %v4180_v25  ;;  %v2472_v25 = vsel %vm1045_vm8, %v6667_v48, %v2471_v29  ;;  %v2505_v53 = vshll.u32 %v2326_v44, 16  ;;  %v2495_v48 = vrot.slane %v2493_v45, 1  ;;  %v2514_v6 = vrot.slane %v2512_v59, 1 }
 0x10e   : > { %v4189_v38 = vsel %vm1612_vm9, %v4187_v26, %v4188_v14  ;;  %v2510_v14 = vshrl.u32 %v2327_v33, 16 }
 0x10f   : > { %v2507_v60 = vrot.slane %v2505_v53, 1  ;;  %v2496_v26 = vsel %vm1045_vm8, %v6687_v52, %v2495_v48  ;;  %v4212_v52 = vrot.slane %v4137_v3, 1 }
 0x110   : > { %v2515_v54 = vor.u32 %v2514_v6, %v2510_v14 }
 0x113   : > { %5301 = vmatmul.mubr.msk.bf16.gmra.mrb[24].mxu1 %vm213_vm1, %v6656_v9  ;;  %v2436_v9 = vsel %vm1045_vm8, %v6639_v4, %v2435_v37  ;;  %v2322_v4 = vld [vmem:[#allocation2 + $0xd8] sm:$0x1]  ;;  %v4210_v37 = vsel %vm1612_vm9, %v4208_v24, %v4209_v49 }
 0x114   : > { %5447 = vmatmul.mubr.msk.bf16.vlgmr.msra.gmra.mrb[0].mxu0 %vm213_vm1, %v4183_v0  ;;  %5304 = vmatprep.mubr.msk.bf16.mxu1 %vm213_vm1, %v6676_v2  ;;  %v4193_v2 = vrot.slane %v4124_v17, 1  ;;  %v2481_v32 = vshll.u32 %v2322_v4, 16  ;;  %v4205_v0 = vrot.slane %v4132_v21, 1  ;;  %v4211_v17 = vrot.slane %v4136_v62, 1 }
 0x115   : > { %5450 = vmatprep.mubr.msk.bf16.mxu0 %vm213_vm1, %v4186_v8  ;;  %v4206_v8 = vrot.slane %v4133_v30, 1 }
 0x116   : > { %v4195_v13 = vsel %vm1612_vm9, %v4193_v2, %v4194_v58  ;;  %v2483_v15 = vrot.slane %v2481_v32, 1  ;;  %v4213_v40 = vsel %vm1612_vm9, %v4211_v17, %v4212_v52  ;;  %v4140_v58 = vld [vmem:[#allocation2 + $0xf0] sm:$0xfe] }
 0x117   : > { %v4207_v61 = vsel %vm1612_vm9, %v4205_v0, %v4206_v8  ;;  %v4217_v36 = vrot.slane %v4140_v58, 1 }
 0x118   : > { %v2484_v16 = vsel %vm1045_vm8, %v6682_v5, %v2483_v15  ;;  %v2328_v5 = vld [vmem:[#allocation2 + $0x108] sm:$0x1] }
 0x119   : > { %v2517_v31 = vshll.u32 %v2328_v5, 16 }
 0x11b   : > { %5305 = vmatmul.mubr.msk.bf16.gmra.mrb[28].mxu1 %vm213_vm1, %v6422_v7  ;;  %v4198_v7 = vsel %vm1612_vm9, %v4196_v43, %v4197_v11  ;;  %v4142_v43 = vld [vmem:[#allocation2 + $0x100] sm:$0xfe]  ;;  %v4143_v11 = vld [vmem:[#allocation2 + $0x108] sm:$0x1] }
 0x11c   : > { %5451 = vmatmul.mubr.msk.bf16.gmra.mrb[4].mxu0 %vm213_vm1, %v4189_v38  ;;  %5326 = vmatprep.mubr.msk.bf16.mxu1 %vm213_vm1, %v2436_v9  ;;  %v2508_v38 = vsel %vm1045_vm8, %v6700_v22, %v2507_v60  ;;  %v2519_v9 = vrot.slane %v2517_v31, 1  ;;  %v4220_v4 = vrot.slane %v4142_v43, 1 }
 0x11d   : > { %5454 = vmatprep.mubr.msk.bf16.mxu0 %vm213_vm1, %v4192_v39  ;;  %v4139_v39 = vld [vmem:[#allocation2 + $0xe8] sm:$0x1] }
 0x11e   : > { %v4215_v1 = vrot.slane %v4139_v39, 1  ;;  %v2520_v22 = vsel %vm1045_vm8, %v2515_v54, %v2519_v9 }
 0x120   : > { %v4216_v2 = vsel %vm1612_vm9, %v4214_v42, %v4215_v1 }
 0x123   : > { %5327 = vmatmul.mubr.msk.bf16.vlgmr.msra.gmra.mrb[16].mxu1 %vm213_vm1, %v2448_v56  ;;  %v4219_v56 = vsel %vm1612_vm9, %v4217_v36, %v4218_v23 }
 0x124   : > { %5455 = vmatmul.mubr.msk.bf16.gmra.mrb[8].mxu0 %vm213_vm1, %v4195_v13  ;;  %5330 = vmatprep.mubr.msk.bf16.mxu1 %vm213_vm1, %v2460_v28  ;;  %v4221_v13 = vrot.slane %v4143_v11, 1  ;;  %v4224_v28 = vrot.slane %v4145_v63, 1 }
 0x125   : > { %5458 = vmatprep.mubr.msk.bf16.mxu0 %vm213_vm1, %v4198_v7  ;;  %v4144_v7 = vld [vmem:[#allocation2 + $0x110] sm:$0xfe] }
 0x126   : > { %v4222_v19 = vsel %vm1612_vm9, %v4220_v4, %v4221_v13  ;;  %v4223_v41 = vrot.slane %v4144_v7, 1 }
 0x128   : > { %v4225_v32 = vsel %vm1612_vm9, %v4223_v41, %v4224_v28 }
 0x12b   : > { %5331 = vmatmul.mubr.msk.bf16.gmra.mrb[20].mxu1 %vm213_vm1, %v2472_v25 }
 0x12c   : > { %5459 = vmatmul.mubr.msk.bf16.gmra.mrb[12].mxu0 %vm213_vm1, %v4201_v47  ;;  %5334 = vmatprep.mubr.msk.bf16.mxu1 %vm213_vm1, %v2484_v16 }
 0x12d   : > { %5462 = vmatprep.mubr.msk.bf16.mxu0 %vm213_vm1, %v4204_v46 }
 0x133   : > { %5335 = vmatmul.mubr.msk.bf16.gmra.mrb[24].mxu1 %vm213_vm1, %v2496_v26 }
 0x134   : > { %5463 = vmatmul.mubr.msk.bf16.gmra.mrb[16].mxu0 %vm213_vm1, %v4207_v61  ;;  %5338 = vmatprep.mubr.msk.bf16.mxu1 %vm213_vm1, %v2508_v38 }
 0x135   : > { %5466 = vmatprep.mubr.msk.bf16.mxu0 %vm213_vm1, %v4210_v37 }
 0x13b   : > { %5339 = vmatmul.mubr.msk.bf16.gmra.mrb[28].mxu1 %vm213_vm1, %v2520_v22 }
 0x13c   : > { %5467 = vmatmul.mubr.msk.bf16.gmra.mrb[20].mxu0 %vm213_vm1, %v4213_v40 }
 0x13d   : > { %5470 = vmatprep.mubr.msk.bf16.mxu0 %vm213_vm1, %v4216_v2 }
 0x144   : > { %5471 = vmatmul.mubr.msk.bf16.gmra.mrb[24].mxu0 %vm213_vm1, %v4219_v56 }
 0x145   : > { %5474 = vmatprep.mubr.msk.bf16.mxu0 %vm213_vm1, %v4222_v19 }
 0x14c   : > { %5475 = vmatmul.mubr.msk.bf16.gmra.mrb[28].mxu0 %vm213_vm1, %v4225_v32 }
 0x1b6   : > { %v5278_v35 = vpop.f32.mrb[0].mxu1 }
 0x1b7   : > { %v2106_v50 = vpop.f32.mrb[1].mxu1 }
 0x1b8   : > { %v5279_v18 = vpop.f32.mrb[2].mxu1 }
 0x1b9   : > { %v2109_v34 = vpop.f32.mrb[3].mxu1 }
 0x1be   : > { %v5282_v29 = vpop.f32.mrb[4].mxu1 }
 0x1bf   : > { %v2122_v12 = vpop.f32.mrb[5].mxu1 }
 0x1c0   : > { %v5283_v27 = vpop.f32.mrb[6].mxu1 }
 0x1c1   : > { %v2125_v15 = vpop.f32.mrb[7].mxu1 }
 0x1c6   : > { %v5286_v51 = vpop.f32.mrb[8].mxu1 }
 0x1c7   : > { %v2138_v44 = vpop.f32.mrb[9].mxu1 }
 0x1c8   : > { %v6782_v47 = vpop.f32.mrb[10].mxu1 }
 0x1c9   : > { %v6784_v25 = vpop.f32.mrb[11].mxu1 }
 0x1ce   : > { %v6786_v21 = vpop.f32.mrb[12].mxu1 }
 0x1cf   : > { %v6788_v30 = vpop.f32.mrb[13].mxu1 }
 0x1d0   : > { %v6790_v45 = vpop.f32.mrb[14].mxu1 }
 0x1d1   : > { %v6792_v46 = vpop.f32.mrb[15].mxu1 }
 0x1e7   : > { %v5448_v16 = vpop.f32.mrb[0].mxu0 }
 0x1e8   : > { %v5480_v53 = vadd.f32 %v5448_v16, %v5278_v35  ;;  %v4345_v33 = vpop.f32.mrb[1].mxu0 }
 0x1e9   : > { %v5481_v55 = vadd.f32 %v4345_v33, %v2106_v50  ;;  %v5449_v57 = vpop.f32.mrb[2].mxu0 }
 0x1ea   : > { %4570 = vst [vmem:[%s6798_s6 + $0x10] sm:$0xff] %v5480_v53  ;;  %v5482_v0 = vadd.f32 %v5449_v57, %v5279_v18  ;;  %v4348_v8 = vpop.f32.mrb[3].mxu0  ;;  %v4640_v60 = vmul.f32 %v5480_v53, %v5480_v53 }
 0x1eb   : > { %4568 = vst [vmem:[%s6798_s6] sm:$0xff] %v5481_v55  ;;  %v5483_v48 = vadd.f32 %v4348_v8, %v2109_v34  ;;  %v4638_v59 = vmul.f32 %v5481_v55, %v5481_v55 }
 0x1ec   : > { %4571 = vst [vmem:[%s6798_s6 + $0x18] sm:$0xff] %v5482_v0  ;;  %v4641_v31 = vmul.f32 %v5482_v0, %v5482_v0 }
 0x1ed   : > { %4569 = vst [vmem:[%s6798_s6 + $0x8] sm:$0xff] %v5483_v48  ;;  %v4600_v24 = vadd.f32 %v5483_v48, %v5481_v55  ;;  %v4639_v49 = vmul.f32 %v5483_v48, %v5483_v48 }
 0x1ef   : > { %v4601_v5 = vadd.f32 %v5480_v53, %v4600_v24  ;;  %v4670_v61 = vadd.f32 %v4639_v49, %v4638_v59  ;;  %v5452_v26 = vpop.f32.mrb[4].mxu0 }
 0x1f0   : > { %v5484_v14 = vadd.f32 %v5452_v26, %v5282_v29  ;;  %v4361_v6 = vpop.f32.mrb[5].mxu0 }
 0x1f1   : > { %v4671_v37 = vadd.f32 %v4670_v61, %v4640_v60  ;;  %v5485_v62 = vadd.f32 %v4361_v6, %v2122_v12  ;;  %v4602_v3 = vadd.f32 %v5482_v0, %v4601_v5  ;;  %v5453_v38 = vpop.f32.mrb[6].mxu0 }
 0x1f2   : > { %4574 = vst [vmem:[%s6798_s6 + $0x30] sm:$0xff] %v5484_v14  ;;  %v5486_v10 = vadd.f32 %v5453_v38, %v5283_v27  ;;  %v4364_v39 = vpop.f32.mrb[7].mxu0  ;;  %v4644_v22 = vmul.f32 %v5484_v14, %v5484_v14 }
 0x1f3   : > { %4572 = vst [vmem:[%s6798_s6 + $0x20] sm:$0xff] %v5485_v62  ;;  %v4603_v17 = vadd.f32 %v5485_v62, %v4602_v3  ;;  %v4642_v52 = vmul.f32 %v5485_v62, %v5485_v62  ;;  %v4672_v54 = vadd.f32 %v4671_v37, %v4641_v31  ;;  %v5487_v9 = vadd.f32 %v4364_v39, %v2125_v15 }
 0x1f4   : > { %4575 = vst [vmem:[%s6798_s6 + $0x38] sm:$0xff] %v5486_v10  ;;  %v4645_v4 = vmul.f32 %v5486_v10, %v5486_v10 }
 0x1f5   : > { %v4673_v42 = vadd.f32 %v4672_v54, %v4642_v52  ;;  %4573 = vst [vmem:[%s6798_s6 + $0x28] sm:$0xff] %v5487_v9  ;;  %v4604_v1 = vadd.f32 %v5487_v9, %v4603_v17  ;;  %v4643_v40 = vmul.f32 %v5487_v9, %v5487_v9 }
 0x1f6   : > { %v5328_v43 = vpop.f32.mrb[16].mxu1 }
 0x1f7   : > { %v4605_v2 = vadd.f32 %v5484_v14, %v4604_v1  ;;  %v4674_v58 = vadd.f32 %v4673_v42, %v4643_v40  ;;  %v5456_v20 = vpop.f32.mrb[8].mxu0  ;;  %v2704_v23 = vpop.f32.mrb[17].mxu1 }
 0x1f8   : > { %v5488_v11 = vadd.f32 %v5456_v20, %v5286_v51  ;;  %v4377_v36 = vpop.f32.mrb[9].mxu0  ;;  %v5329_v63 = vpop.f32.mrb[18].mxu1 }
 0x1f9   : > { %v4675_v13 = vadd.f32 %v4674_v58, %v4644_v22  ;;  %v5489_v56 = vadd.f32 %v4377_v36, %v2138_v44  ;;  %v4606_v19 = vadd.f32 %v5486_v10, %v4605_v2  ;;  %v5457_v7 = vpop.f32.mrb[10].mxu0  ;;  %v2707_v32 = vpop.f32.mrb[19].mxu1 }
 0x1fa   : > { %4578 = vst [vmem:[%s6798_s6 + $0x50] sm:$0xff] %v5488_v11  ;;  %v5490_v41 = vadd.f32 %v5457_v7, %v6782_v47  ;;  %v4380_v28 = vpop.f32.mrb[11].mxu0  ;;  %v4648_v15 = vmul.f32 %v5488_v11, %v5488_v11 }
 0x1fb   : > { %4576 = vst [vmem:[%s6798_s6 + $0x40] sm:$0xff] %v5489_v56  ;;  %v4607_v35 = vadd.f32 %v5489_v56, %v4606_v19  ;;  %v4646_v50 = vmul.f32 %v5489_v56, %v5489_v56  ;;  %v4676_v18 = vadd.f32 %v4675_v13, %v4645_v4  ;;  %v5491_v34 = vadd.f32 %v4380_v28, %v6784_v25 }
 0x1fc   : > { %4579 = vst [vmem:[%s6798_s6 + $0x58] sm:$0xff] %v5490_v41  ;;  %v4649_v57 = vmul.f32 %v5490_v41, %v5490_v41 }
 0x1fd   : > { %v4677_v29 = vadd.f32 %v4676_v18, %v4646_v50  ;;  %4577 = vst [vmem:[%s6798_s6 + $0x48] sm:$0xff] %v5491_v34  ;;  %v4608_v12 = vadd.f32 %v5491_v34, %v4607_v35  ;;  %v4647_v27 = vmul.f32 %v5491_v34, %v5491_v34 }
 0x1fe   : > { %v5332_v47 = vpop.f32.mrb[20].mxu1 }
 0x1ff   : > { %v4609_v51 = vadd.f32 %v5488_v11, %v4608_v12  ;;  %v4678_v44 = vadd.f32 %v4677_v29, %v4647_v27  ;;  %v5460_v16 = vpop.f32.mrb[12].mxu0  ;;  %v2720_v55 = vpop.f32.mrb[21].mxu1 }
 0x200   : > { %v5492_v53 = vadd.f32 %v5460_v16, %v6786_v21  ;;  %v4393_v33 = vpop.f32.mrb[13].mxu0  ;;  %v5333_v59 = vpop.f32.mrb[22].mxu1 }
 0x201   : > { %v4679_v0 = vadd.f32 %v4678_v44, %v4648_v15  ;;  %v5493_v25 = vadd.f32 %v4393_v33, %v6788_v30  ;;  %v4610_v8 = vadd.f32 %v5490_v41, %v4609_v51  ;;  %v5461_v48 = vpop.f32.mrb[14].mxu0  ;;  %v2723_v60 = vpop.f32.mrb[23].mxu1 }
 0x202   : > { %4582 = vst [vmem:[%s6798_s6 + $0x70] sm:$0xff] %v5492_v53  ;;  %v5494_v24 = vadd.f32 %v5461_v48, %v6790_v45  ;;  %v4396_v49 = vpop.f32.mrb[15].mxu0  ;;  %v4652_v31 = vmul.f32 %v5492_v53, %v5492_v53 }
 0x203   : > { %4580 = vst [vmem:[%s6798_s6 + $0x60] sm:$0xff] %v5493_v25  ;;  %v4611_v5 = vadd.f32 %v5493_v25, %v4610_v8  ;;  %v4650_v61 = vmul.f32 %v5493_v25, %v5493_v25  ;;  %v4680_v21 = vadd.f32 %v4679_v0, %v4649_v57  ;;  %v5495_v26 = vadd.f32 %v4396_v49, %v6792_v46 }
 0x204   : > { %4583 = vst [vmem:[%s6798_s6 + $0x78] sm:$0xff] %v5494_v24  ;;  %v4653_v17 = vmul.f32 %v5494_v24, %v5494_v24 }
 0x205   : > { %v4681_v14 = vadd.f32 %v4680_v21, %v4650_v61  ;;  %4581 = vst [vmem:[%s6798_s6 + $0x68] sm:$0xff] %v5495_v26  ;;  %v4612_v6 = vadd.f32 %v5495_v26, %v4611_v5  ;;  %v4651_v30 = vmul.f32 %v5495_v26, %v5495_v26 }
 0x206   : > { %v5336_v45 = vpop.f32.mrb[24].mxu1 }
 0x207   : > { %v4613_v37 = vadd.f32 %v5492_v53, %v4612_v6  ;;  %v4682_v62 = vadd.f32 %v4681_v14, %v4651_v30  ;;  %v5464_v3 = vpop.f32.mrb[16].mxu0  ;;  %v2736_v39 = vpop.f32.mrb[25].mxu1 }
 0x208   : > { %v5496_v38 = vadd.f32 %v5464_v3, %v5328_v43  ;;  %v4409_v10 = vpop.f32.mrb[17].mxu0  ;;  %v5337_v42 = vpop.f32.mrb[26].mxu1 }
 0x209   : > { %v4683_v52 = vadd.f32 %v4682_v62, %v4652_v31  ;;  %v5497_v46 = vadd.f32 %v4409_v10, %v2704_v23  ;;  %v4614_v54 = vadd.f32 %v5494_v24, %v4613_v37  ;;  %v5465_v9 = vpop.f32.mrb[18].mxu0  ;;  %v2739_v22 = vpop.f32.mrb[27].mxu1 }
 0x20a   : > { %4586 = vst [vmem:[%s6798_s6 + $0x90] sm:$0xff] %v5496_v38  ;;  %v5498_v1 = vadd.f32 %v5465_v9, %v5329_v63  ;;  %v4412_v40 = vpop.f32.mrb[19].mxu0  ;;  %v4656_v13 = vmul.f32 %v5496_v38, %v5496_v38 }
 0x20b   : > { %4584 = vst [vmem:[%s6798_s6 + $0x80] sm:$0xff] %v5497_v46  ;;  %v4615_v2 = vadd.f32 %v5497_v46, %v4614_v54  ;;  %v4654_v58 = vmul.f32 %v5497_v46, %v5497_v46  ;;  %v4684_v20 = vadd.f32 %v4683_v52, %v4653_v17  ;;  %v5499_v11 = vadd.f32 %v4412_v40, %v2707_v32 }
 0x20c   : > { %4587 = vst [vmem:[%s6798_s6 + $0x98] sm:$0xff] %v5498_v1  ;;  %v4657_v35 = vmul.f32 %v5498_v1, %v5498_v1 }
 0x20d   : > { %v4685_v43 = vadd.f32 %v4684_v20, %v4654_v58  ;;  %4585 = vst [vmem:[%s6798_s6 + $0x88] sm:$0xff] %v5499_v11  ;;  %v4616_v36 = vadd.f32 %v5499_v11, %v4615_v2  ;;  %v4655_v4 = vmul.f32 %v5499_v11, %v5499_v11 }
 0x20e   : > { %v5340_v7 = vpop.f32.mrb[28].mxu1 }
 0x20f   : > { %v4617_v23 = vadd.f32 %v5496_v38, %v4616_v36  ;;  %v4686_v56 = vadd.f32 %v4685_v43, %v4655_v4  ;;  %v5468_v19 = vpop.f32.mrb[20].mxu0  ;;  %v2752_v28 = vpop.f32.mrb[29].mxu1 }
 0x210   : > { %v5500_v63 = vadd.f32 %v5468_v19, %v5332_v47  ;;  %v4425_v41 = vpop.f32.mrb[21].mxu0  ;;  %v5341_v29 = vpop.f32.mrb[30].mxu1 }
 0x211   : > { %v4687_v50 = vadd.f32 %v4686_v56, %v4656_v13  ;;  %v5501_v32 = vadd.f32 %v4425_v41, %v2720_v55  ;;  %v4618_v18 = vadd.f32 %v5498_v1, %v4617_v23  ;;  %v5469_v34 = vpop.f32.mrb[22].mxu0  ;;  %v2755_v15 = vpop.f32.mrb[31].mxu1 }
 0x212   : > { %4590 = vst [vmem:[%s6798_s6 + $0xb0] sm:$0xff] %v5500_v63  ;;  %v5502_v12 = vadd.f32 %v5469_v34, %v5333_v59  ;;  %v4428_v27 = vpop.f32.mrb[23].mxu0  ;;  %v4660_v55 = vmul.f32 %v5500_v63, %v5500_v63 }
 0x213   : > { %4588 = vst [vmem:[%s6798_s6 + $0xa0] sm:$0xff] %v5501_v32  ;;  %v4619_v51 = vadd.f32 %v5501_v32, %v4618_v18  ;;  %v4658_v44 = vmul.f32 %v5501_v32, %v5501_v32  ;;  %v4688_v16 = vadd.f32 %v4687_v50, %v4657_v35  ;;  %v5503_v53 = vadd.f32 %v4428_v27, %v2723_v60 }
 0x214   : > { %4591 = vst [vmem:[%s6798_s6 + $0xb8] sm:$0xff] %v5502_v12  ;;  %v4661_v24 = vmul.f32 %v5502_v12, %v5502_v12 }
 0x215   : > { %v4689_v47 = vadd.f32 %v4688_v16, %v4658_v44  ;;  %4589 = vst [vmem:[%s6798_s6 + $0xa8] sm:$0xff] %v5503_v53  ;;  %v4620_v33 = vadd.f32 %v5503_v53, %v4619_v51  ;;  %v4659_v57 = vmul.f32 %v5503_v53, %v5503_v53 }
 0x217   : > { %v4621_v0 = vadd.f32 %v5500_v63, %v4620_v33  ;;  %v4690_v25 = vadd.f32 %v4689_v47, %v4659_v57  ;;  %v5472_v8 = vpop.f32.mrb[24].mxu0 }
 0x218   : > { %v5504_v48 = vadd.f32 %v5472_v8, %v5336_v45  ;;  %v4441_v59 = vpop.f32.mrb[25].mxu0 }
 0x219   : > { %v4691_v49 = vadd.f32 %v4690_v25, %v4660_v55  ;;  %v5505_v5 = vadd.f32 %v4441_v59, %v2736_v39  ;;  %v4622_v61 = vadd.f32 %v5502_v12, %v4621_v0  ;;  %v5473_v60 = vpop.f32.mrb[26].mxu0 }
 0x21a   : > { %4594 = vst [vmem:[%s6798_s6 + $0xd0] sm:$0xff] %v5504_v48  ;;  %v5506_v21 = vadd.f32 %v5473_v60, %v5337_v42  ;;  %v4444_v26 = vpop.f32.mrb[27].mxu0  ;;  %v4664_v45 = vmul.f32 %v5504_v48, %v5504_v48 }
 0x21b   : > { %4592 = vst [vmem:[%s6798_s6 + $0xc0] sm:$0xff] %v5505_v5  ;;  %v4623_v14 = vadd.f32 %v5505_v5, %v4622_v61  ;;  %v4662_v6 = vmul.f32 %v5505_v5, %v5505_v5  ;;  %v4692_v30 = vadd.f32 %v4691_v49, %v4661_v24  ;;  %v5507_v31 = vadd.f32 %v4444_v26, %v2739_v22 }
 0x21c   : > { %4595 = vst [vmem:[%s6798_s6 + $0xd8] sm:$0xff] %v5506_v21  ;;  %v4665_v46 = vmul.f32 %v5506_v21, %v5506_v21 }
 0x21d   : > { %v4693_v37 = vadd.f32 %v4692_v30, %v4662_v6  ;;  %4593 = vst [vmem:[%s6798_s6 + $0xc8] sm:$0xff] %v5507_v31  ;;  %v4624_v62 = vadd.f32 %v5507_v31, %v4623_v14  ;;  %v4663_v3 = vmul.f32 %v5507_v31, %v5507_v31 }
 0x21f   : > { %v4625_v38 = vadd.f32 %v5504_v48, %v4624_v62  ;;  %v4694_v10 = vadd.f32 %v4693_v37, %v4663_v3  ;;  %v5476_v39 = vpop.f32.mrb[28].mxu0 }
 0x220   : > { %v5508_v17 = vadd.f32 %v5476_v39, %v5340_v7  ;;  %v4457_v52 = vpop.f32.mrb[29].mxu0 }
 0x221   : > { %v4695_v54 = vadd.f32 %v4694_v10, %v4664_v45  ;;  %v5509_v9 = vadd.f32 %v4457_v52, %v2752_v28  ;;  %v4626_v42 = vadd.f32 %v5506_v21, %v4625_v38  ;;  %v5477_v1 = vpop.f32.mrb[30].mxu0 }
 0x222   : > { %4598 = vst [vmem:[%s6798_s6 + $0xf0] sm:$0xff] %v5508_v17  ;;  %v5510_v40 = vadd.f32 %v5477_v1, %v5341_v29  ;;  %v4460_v22 = vpop.f32.mrb[31].mxu0 }
 0x223   : > { %4596 = vst [vmem:[%s6798_s6 + $0xe0] sm:$0xff] %v5509_v9  ;;  %v4627_v2 = vadd.f32 %v5509_v9, %v4626_v42  ;;  %v4666_v58 = vmul.f32 %v5509_v9, %v5509_v9  ;;  %v4696_v20 = vadd.f32 %v4695_v54, %v4665_v46  ;;  %v5511_v11 = vadd.f32 %v4460_v22, %v2755_v15 }
 0x224   : > { %4599 = vst [vmem:[%s6798_s6 + $0xf8] sm:$0xff] %v5510_v40 }
 0x225   : > { %v4697_v43 = vadd.f32 %v4696_v20, %v4666_v58  ;;  %4597 = vst [vmem:[%s6798_s6 + $0xe8] sm:$0xff] %v5511_v11  ;;  %v4628_v36 = vadd.f32 %v5511_v11, %v4627_v2  ;;  %v4667_v4 = vmul.f32 %v5511_v11, %v5511_v11 }
 0x226   : > { %5823 = shalt.err (!%p5820_p3)
}
 0x227   : > { %s5824_s26 = scalar_lea.hbm %s6840_s11, 4096  ;;  %s5828_s29 = scalar_lea.hbm %s6921_s2, 8192 }
 0x228   : > { %p5825_p4 = scmp.ne.s32.totalorder %s6840_s11, %s5824_s26  ;;  %p5829_p9 = scmp.lt.u32.totalorder %s6840_s11, %s6921_s2 }
 0x229   : > { %p5830_p10 = scmp.lt.u32.totalorder %s5828_s29, %s5824_s26  ;;  %p5832_p12 = scmp.lt.u32.totalorder %s5824_s26, %s6840_s11 }
 0x22a   : > { %p5826_p7 = pnand %p5825_p4, %p5969_p5 }
 0x22b   : > { %p5831_p11 = por %p5830_p10, %p5829_p9 }
 0x22c   : > { %p5827_p8 = pneg %p5826_p7 }
 0x22d   : > { %p5833_p13 = por %p5832_p12, %p5831_p11 }
 0x22f   : > { %p5834_p0 = pnand %p5833_p13, %p5827_p8 }
 0x231   : > { %5837 = shalt.err (!%p5834_p0)
}
 0x232   : > { %s5908_s6 = smov 128   ;;  %s5909_s7 = smov 8   ;;  %v4668_v13 = vmul.f32 %v5508_v17, %v5508_v17  ;;  %v4629_v23 = vadd.f32 %v5508_v17, %v4628_v36  ;;  %v4698_v56 = vadd.f32 %v4697_v43, %v4667_v4  ;;  %v4669_v19 = vmul.f32 %v5510_v40, %v5510_v40 }
 0x233   : > { %5746 = dma.vmem_to_hbm [thread:$0]  (%p5969_p5), %s6842_s8, 4096, %s6840_s11, %s4709_s17, %s5908_s6, %s5908_s6, %s5909_s7  }
 0x234   : > { %v4630_v7 = vadd.f32 %v5510_v40, %v4629_v23  ;;  %v4699_v63 = vadd.f32 %v4698_v56, %v4668_v13  ;;  %s4839_s9 = sshll.u32 %s6795_s4, 1  ;;  %s5014_s8 = sshll.u32 %s5952_s16, 5 }
 0x235   : > { %s174_s10 = scalar_lea.vmem [#allocation6], %s4839_s9  ;;  %s6876_s20 = scalar_lea.hbm %s6922_s3, %s5014_s8 }
 0x236   : > { %v4631_v41 = vrot.slane %v4630_v7, 4  ;;  %v4700_v28 = vadd.f32 %v4699_v63, %v4669_v19  ;;  %s4743_s11 = sshll.u32 %s174_s10, 4  ;;  %s4714_s24 = scalar_lea.sflag [#allocation7], %s6795_s4  ;;  %s6878_s11 = int_to_ptr.vmem [resolvable:$true] %s4743_s11 }
 0x237   : > { %s5838_s25 = scalar_lea.vmem %s6878_s11, 32  ;;  %s5910_s16 = smov [#allocation6]  }
 0x238   : > { %v4632_v35 = vadd.f32 %v4631_v41, %v4630_v7  ;;  %v4701_v50 = vrot.slane %v4700_v28, 4  ;;  %p5839_p1 = scmp.ne.s32.totalorder %s6878_s11, %s5838_s25  ;;  %s5842_s26 = sshll.u32 %s5910_s16, 4  ;;  %s5843_s26 = int_to_ptr.vmem [resolvable:$false] %s5842_s26 }
 0x239   : > { %s5844_s27 = scalar_lea.vmem %s5843_s26, 64  ;;  %p5845_p4 = scmp.lt.s32.totalorder %s6878_s11, %s5843_s26 }
 0x23a   : > { %v4633_v32 = vrot.slane %v4632_v35, 2  ;;  %v4702_v18 = vadd.f32 %v4701_v50, %v4700_v28  ;;  %p5840_p2 = pnand %p5839_p1, %p5969_p5  ;;  %p5846_p7 = scmp.lt.s32.totalorder %s5844_s27, %s5838_s25 }
 0x23c   : > { %v4634_v34 = vadd.f32 %v4633_v32, %v4632_v35  ;;  %v4703_v29 = vrot.slane %v4702_v18, 2  ;;  %p5841_p3 = pneg %p5840_p2  ;;  %p5847_p8 = por %p5846_p7, %p5845_p4 }
 0x23e   : > { %v4635_v12 = vrot.slane %v4634_v34, 1  ;;  %v4704_v27 = vadd.f32 %v4703_v29, %v4702_v18  ;;  %p5848_p9 = pnand %p5847_p8, %p5841_p3 }
 0x240   : > { %v4636_v15 = vadd.f32 %v4635_v12, %v4634_v34  ;;  %v4705_v51 = vrot.slane %v4704_v27, 1 }
 0x242   : > { %4637 = vst [vmem:[%s174_s10] sm:$0x1] %v4636_v15  ;;  %v4706_v44 = vadd.f32 %v4705_v51, %v4704_v27 }
 0x244   : > { %4707 = vst [vmem:[%s174_s10 + $0x1] sm:$0x1] %v4706_v44 }
 0x245   : > { %5851 = shalt.err (!%p5848_p9)
}
 0x246   : > { %s5852_s4 = scalar_lea.hbm %s6876_s20, 32  ;;  %s5856_s30 = scalar_lea.hbm %s6922_s3, 64 }
 0x247   : > { %p5853_p10 = scmp.ne.s32.totalorder %s6876_s20, %s5852_s4  ;;  %p5857_p13 = scmp.lt.u32.totalorder %s6876_s20, %s6922_s3 }
 0x248   : > { %p5858_p0 = scmp.lt.u32.totalorder %s5856_s30, %s5852_s4  ;;  %p5860_p2 = scmp.lt.u32.totalorder %s5852_s4, %s6876_s20 }
 0x249   : > { %p5854_p11 = pnand %p5853_p10, %p5969_p5 }
 0x24a   : > { %p5859_p1 = por %p5858_p0, %p5857_p13 }
 0x24b   : > { %p5855_p12 = pneg %p5854_p11 }
 0x24c   : > { %p5861_p3 = por %p5860_p2, %p5859_p1 }
 0x24e   : > { %p5862_p4 = pnand %p5861_p3, %p5855_p12 }
 0x250   : > { %5865 = shalt.err (!%p5862_p4)
}
 0x251   : > { %5747 = dma.vmem_to_hbm [thread:$0]  (%p5969_p5), %s6878_s11, 32, %s6876_s20, %s4714_s24  }
 0x252 PF: > { %p5757_p7 = scmp.ge.s32.totalorder %s5904_s15, 2  ;;  %s4755_s7 = sand.u32 1, %s5892_s12  }
 0x253   : > { %s4756_s9 = scalar_lea.sflag [#allocation5], %s4755_s7 }
 0x254   : > { %p5751_p8 = pnand %p5757_p7, %p5973_p6 }
 0x256   : > { %5883 = dma.done.wait (!%p5751_p8), %s4756_s9, 4096  }
 0x257   : > { %5885 = vsyncadd (!%p5751_p8), %s4756_s9, 4294963200  ;;  %s4765_s8 = scalar_lea.sflag [#allocation7], %s4755_s7 }
 0x258   : > { %5887 = dma.done.wait (!%p5751_p8), %s4765_s8, 32  }
 0x259   : > { %5889 = vsyncadd (!%p5751_p8), %s4765_s8, 4294967264  ;;  %p17_p5 = scmp.ge.s32.totalorder %s5956_s18, 4   ;;  %s6931_s12 = smov %s5896_s13 }
 0x25a   : > { %s6932_s13 = smov %s5900_s14  ;;  %s6933_s14 = smov %s5967_s21 }
 0x25b   : > { %s6934_s15 = smov %s5956_s18  ;;  %19 = sbr.rel (!%p17_p5) target bundleno = 5 (0x5), region = 91 }
 0x262   :  { %4770 = vsyncpa [#allocation5], 1 }
 0x263   :  { %4772 = vsyncpa [#allocation5 + $0x1], 1 }
 0x264   :  { %4773 = vsyncpa [#allocation7], 1 }
 0x265   :  { %4775 = vsyncpa [#allocation7 + $0x1], 1 }

</bundles_post_ra>
